<compile_context>
chip_gen: v7x
topology: tpu7x:2x2x1
jax: 0.10.0
libtpu: 0.0.40
codegen_flags: <defaults>
</compile_context>

<pallas_src>
import functools
import math

import jax
import jax.numpy as jnp
from jax.experimental import pallas as pl
from jax.experimental.pallas import tpu as pltpu


# ------------------------------ Pallas kernel -------------------------------

def pos_encoding_kernel(idx_ref, table_ref, out_ref):
    idx = idx_ref[...]                                    # (BM, 1) int32
    bm = idx.shape[0]
    max_t = table_ref.shape[0]
    # torch negative-index wrap semantics.
    idx = jnp.where(idx < 0, idx + max_t, idx)
    # one-hot(idx) @ table == table[idx]; one MXU matmul per index block.
    pos = jax.lax.broadcasted_iota(jnp.int32, (bm, max_t), 1)
    onehot = (pos == idx).astype(table_ref.dtype)         # (BM, max_t)
    # f32 table -> HIGHEST (bf16x6) so the gather is bit-exact; bf16 table ->
    # single-pass DEFAULT (0/1 one-hot is exact in bf16).
    prec = (jax.lax.Precision.HIGHEST
            if table_ref.dtype == jnp.float32 else jax.lax.Precision.DEFAULT)
    out_ref[...] = jnp.dot(
        onehot, table_ref[...],
        preferred_element_type=jnp.float32, precision=prec,
    ).astype(out_ref.dtype)


# ------------------------------ JAX wrapper ----------------------------------

def make_pos_encoding_table(emb_size, max_t, dtype=jnp.float32):
    """Mirror of PosEncoding._prepare_emb() (the registered buffer)."""
    assert emb_size % 2 == 0, "emb_size must be even"
    dim_axis = 10000.0 ** (
        jnp.arange(emb_size // 2, dtype=jnp.float32) * 2.0 / emb_size)   # (E/2,)
    timesteps = jnp.arange(max_t, dtype=jnp.float32)                      # (T,)
    pos_in = timesteps[:, None] / dim_axis[None, :]                       # (T, E/2)
    enc = jnp.stack([jnp.sin(pos_in), jnp.cos(pos_in)], axis=-1)          # (T, E/2, 2)
    return enc.reshape(max_t, emb_size).astype(dtype)


def _vmem_limit_bytes(block_m, max_t, emb, itemsize):
    idx_b = 2 * block_m * 128 * 4          # (BM,1) int32 pads to 128 lanes, 2 bufs
    out_b = 2 * block_m * emb * itemsize   # output block, 2 bufs
    tbl_b = 2 * max_t * emb * itemsize     # grid-invariant table (allow 2 bufs)
    onehot_b = block_m * max_t * itemsize  # in-kernel intermediate
    need = idx_b + out_b + tbl_b + onehot_b
    return int(min(max(2 * need, 16 * 1024 * 1024), 32 * 1024 * 1024))


@functools.partial(jax.jit, static_argnames=("tm",))
def pos_encoding_forward(x, encoding, *, tm=1024):
    """x: int array (any shape) -> encoding[x], shape x.shape + (emb_size,)."""
    max_t, emb = encoding.shape
    orig_shape = x.shape
    n = math.prod(orig_shape) if orig_shape else 1

    idx = x.reshape(n, 1).astype(jnp.int32)

    # Shrink the block for tiny inputs; keep sublane dim a multiple of 8.
    block_m = min(tm, pl.cdiv(n, 8) * 8)
    grid_m = pl.cdiv(n, block_m)
    itemsize = jnp.dtype(encoding.dtype).itemsize

    out = pl.pallas_call(
        pos_encoding_kernel,
        out_shape=jax.ShapeDtypeStruct((n, emb), encoding.dtype),
        grid=(grid_m,),
        in_specs=[
            pl.BlockSpec((block_m, 1), lambda i: (i, 0)),       # index block
            pl.BlockSpec((max_t, emb), lambda i: (0, 0)),       # full table
        ],
        out_specs=pl.BlockSpec((block_m, emb), lambda i: (i, 0)),
        compiler_params=pltpu.CompilerParams(
            dimension_semantics=("parallel",),                   # megacore on v7x
            vmem_limit_bytes=_vmem_limit_bytes(block_m, max_t, emb, itemsize),
        ),
    )(idx, encoding)

    return out.reshape(*orig_shape, emb)


# ---------------------------------- main --------------------------------------

if __name__ == "__main__":
    key = jax.random.PRNGKey(0)
    emb_size, max_t = 128, 512

    enc_f32 = make_pos_encoding_table(emb_size, max_t)

    k1, k2, k3 = jax.random.split(key, 3)

    # Small case (single small step; also exercises negative-index wrap).
    B, T = 2, 8
    x_small = jax.random.randint(k1, (B, T), 0, max_t, dtype=jnp.int32)
    x_small = x_small.at[0, 0].set(-1).at[1, 3].set(-max_t)
    out_small = jax.block_until_ready(pos_encoding_forward(x_small, enc_f32))
    ref_small = jax.block_until_ready(enc_f32[x_small])
    assert out_small.shape == (B, T, emb_size), out_small.shape
    assert jnp.allclose(out_small, ref_small, rtol=1e-6, atol=1e-6), \
        float(jnp.max(jnp.abs(out_small - ref_small)))

    # Larger case exercising the multi-step grid + ragged (masked) tail block.
    x_big = jax.random.randint(k2, (4, 300), 0, max_t, dtype=jnp.int32)
    out_big = jax.block_until_ready(pos_encoding_forward(x_big, enc_f32))
    ref_big = jax.block_until_ready(enc_f32[x_big])
    assert out_big.shape == (4, 300, emb_size), out_big.shape
    assert jnp.allclose(out_big, ref_big, rtol=1e-6, atol=1e-6), \
        float(jnp.max(jnp.abs(out_big - ref_big)))

    # bf16 table path: half the HBM/VMEM traffic, single-pass MXU, still exact.
    enc_bf16 = enc_f32.astype(jnp.bfloat16)
    x_bf = jax.random.randint(k3, (3, 200), 0, max_t, dtype=jnp.int32)
    out_bf = jax.block_until_ready(pos_encoding_forward(x_bf, enc_bf16))
    ref_bf = jax.block_until_ready(enc_bf16[x_bf])
    assert out_bf.dtype == jnp.bfloat16, out_bf.dtype
    assert jnp.allclose(out_bf.astype(jnp.float32), ref_bf.astype(jnp.float32),
                        rtol=1e-6, atol=1e-6)

    print("KERNEL_OK")
</pallas_src>

<mosaic_0001>
module attributes {stable_mosaic.version = 11 : i64} {
  func.func @pos_encoding_kernel(%arg0: i32, %arg1: memref<16x1xi32, #tpu.memory_space<vmem>>, %arg2: memref<512x128xf32, #tpu.memory_space<vmem>>, %arg3: memref<16x128xf32, #tpu.memory_space<vmem>>) attributes {dimension_semantics = [#tpu.dimension_semantics<parallel>], iteration_bounds = array<i64: 1>, scalar_prefetch = 0 : i64, scratch_operands = 0 : i64, tpu.core_type = #tpu.core_type<tc>, window_params = [{transform_indices = @transform_0, window_bounds = array<i64: 16, 1>}, {pipeline_mode = #tpu.pipeline_mode<synchronous>, transform_indices = @transform_1, window_bounds = array<i64: 512, 128>}, {transform_indices = @transform_2, window_bounds = array<i64: 16, 128>}]} {
    %c0 = arith.constant 0 : index
    %c0_0 = arith.constant 0 : index
    %0 = vector.load %arg1[%c0, %c0_0] : memref<16x1xi32, #tpu.memory_space<vmem>>, vector<16x1xi32>
    %c0_i32 = arith.constant 0 : i32
    %1 = vector.broadcast %c0_i32 : i32 to vector<16x1xi32>
    %2 = arith.cmpi slt, %0, %1 : vector<16x1xi32>
    %c512_i32 = arith.constant 512 : i32
    %3 = vector.broadcast %c512_i32 : i32 to vector<16x1xi32>
    %4 = arith.addi %0, %3 : vector<16x1xi32>
    %5 = arith.select %2, %4, %0 : vector<16x1xi1>, vector<16x1xi32>
    %6 = tpu.iota {dimensions = array<i32: 1>} : vector<16x512xi32>
    %7 = vector.broadcast %5 : vector<16x1xi32> to vector<16x512xi32>
    %8 = arith.cmpi eq, %6, %7 : vector<16x512xi32>
    %9 = arith.extui %8 : vector<16x512xi1> to vector<16x512xi32>
    %10 = arith.sitofp %9 : vector<16x512xi32> to vector<16x512xf32>
    %c0_1 = arith.constant 0 : index
    %c0_2 = arith.constant 0 : index
    %11 = vector.load %arg2[%c0_1, %c0_2] : memref<512x128xf32, #tpu.memory_space<vmem>>, vector<512x128xf32>
    %cst = arith.constant dense<0.000000e+00> : vector<16x128xf32>
    %12 = tpu.matmul %10, %11, %cst {dimension_numbers = #tpu.dot_dimension_numbers<[1], [0], [0], [1], [0, 0, 1, 1], [], []>, precision = #tpu.contract_precision<fp32>} : vector<16x512xf32>, vector<512x128xf32>, vector<16x128xf32> -> vector<16x128xf32>
    %c0_3 = arith.constant 0 : index
    %c0_4 = arith.constant 0 : index
    %13 = vector.load %arg3[%c0_3, %c0_4] : memref<16x128xf32, #tpu.memory_space<vmem>>, vector<16x128xf32>
    tpu.vector_store %arg3[%c0_3, %c0_4], %12 {strides = array<i32>} : memref<16x128xf32, #tpu.memory_space<vmem>>, vector<16x128xf32>,
    return
  }
  func.func @transform_0(%arg0: i32) -> (i32, i32) {
    %c0_i32 = arith.constant 0 : i32
    %c0_i32_0 = arith.constant 0 : i32
    return %arg0, %c0_i32 : i32, i32
  }
  func.func @transform_1(%arg0: i32) -> (i32, i32) {
    %c0_i32 = arith.constant 0 : i32
    %c0_i32_0 = arith.constant 0 : i32
    %c0_i32_1 = arith.constant 0 : i32
    return %c0_i32, %c0_i32_0 : i32, i32
  }
  func.func @transform_2(%arg0: i32) -> (i32, i32) {
    %c0_i32 = arith.constant 0 : i32
    %c0_i32_0 = arith.constant 0 : i32
    return %arg0, %c0_i32 : i32, i32
  }
}

</mosaic_0001>

<bundles_post_ra>
// kernel: pos_encoding_forward.1
= control target key start
LH: loop header
LB: loop body
LE: loop exit
PB: predicated region body
PF: predicated region fallthrough
CT: control target
= control target key end

     0   :  { %7 = vsyncpa [#allocation3], 0  ;;  %s4485_s0 = inlined_call_operand.vmem [shape: s32[16,1], index: 0, kind: input, shape index: {}]   ;;  %s4486_s1 = inlined_call_operand.hbm [shape: f32[512,128], index: 1, kind: input, shape index: {}]   ;;  %s4487_s2 = inlined_call_operand.hbm [shape: f32[16,128], index: 2, kind: output, shape index: {}]  }
   0x1   :  { %8 = vsyncpa [#allocation4], 0  ;;  %s2916_s9 = smov [#allocation2]   ;;  %s2868_s13 = scalar_lea.hbm %s4486_s1, 8192 }
   0x2   :  { %s16_s10 = sshll.u32 %s2916_s9, 4  ;;  %p2869_p0 = scmp.ne.s32.totalorder %s4486_s1, %s2868_s13  ;;  %s17_s10 = int_to_ptr.vmem [resolvable:$true] %s16_s10 }
   0x3   :  { %p2872_p1 = scmp.lt.u32.totalorder %s2868_s13, %s4486_s1 }
   0x5   :  { %p2874_p2 = pnand %p2872_p1, %p2869_p0 }
   0x7   :  { %2877 = shalt.err (!%p2874_p2)
}
   0x8   :  { %s2878_s18 = scalar_lea.vmem %s17_s10, 8192  ;;  %p2883_p4 = scmp.lt.s32.totalorder %s17_s10, %s17_s10 }
   0x9   :  { %p2879_p3 = scmp.ne.s32.totalorder %s17_s10, %s2878_s18  ;;  %p2884_p5 = scmp.lt.s32.totalorder %s2878_s18, %s2878_s18 }
   0xb   :  { %p2885_p6 = por %p2884_p5, %p2883_p4 }
   0xd   :  { %p2886_p7 = pnand %p2885_p6, %p2879_p3 }
   0xf   :  { %2889 = shalt.err (!%p2886_p7)
}
  0x10   :  { %s2917_s19 = smov 128   ;;  %s2918_s20 = smov 8  }
  0x11   :  { %22 = dma.hbm_to_vmem [thread:$0]  %s4486_s1, 8192, %s17_s10, [#allocation3], %s2917_s19, %s2917_s19, %s2918_s20  }
  0x12   :  { %2912 = dma.done.wait [#allocation3], 8192  }
  0x13   :  { %2913 = vsyncadd [#allocation3], 4294959104  ;;  %v2919_v0 = vmov 0   ;;  %v26_v1 = vld [vmem:[%s4485_s0] sm:$0xff]  ;;  %v27_v2 = vld [vmem:[%s4485_s0 + $0x8] sm:$0xff]  ;;  %s2922_s0 = smov [#allocation5]  }
  0x14   :  { %2867 = vset.pattern.permute.xlu0 %v2919_v0  ;;  %v2959_v3 = vld [vmem:[#allocation2 + $0x80] sm:$0xff]  ;;  %vm28_vm0 = vcmp.lt.s32.totalorder %v26_v1, 0  ;;  %v30_v4 = vadd.s32 512, %v26_v1  ;;  %vm29_vm1 = vcmp.lt.s32.totalorder %v27_v2, 0  ;;  %v31_v5 = vadd.s32 512, %v27_v2  ;;  %v86_v6 = vld [vmem:[#allocation2 + $0x88] sm:$0xff] }
  0x15   :  { %v2961_v7 = vld [vmem:[#allocation2] sm:$0xff]  ;;  %v182_v8 = vand.u32 4294901760, %v2959_v3  ;;  %v185_v9 = vand.u32 4294901760, %v86_v6  ;;  %v2964_v10 = vld [vmem:[#allocation2 + $0x8] sm:$0xff]  ;;  %v2967_v12 = vld [vmem:[#allocation2 + $0x90] sm:$0xff]  ;;  %s1976_s1 = sshll.u32 %s2922_s0, 4  ;;  %s1977_s1 = int_to_ptr.vmem [resolvable:$true] %s1976_s1 }
  0x16   :  { %v134_v11 = vand.u32 4294901760, %v2961_v7  ;;  %v2969_v13 = vld [vmem:[#allocation2 + $0x98] sm:$0xff]  ;;  %v32_v14 = vsel %vm28_vm0, %v30_v4, %v26_v1  ;;  %v33_v15 = vsel %vm29_vm1, %v31_v5, %v27_v2  ;;  %v137_v16 = vand.u32 4294901760, %v2964_v10  ;;  %v2973_v18 = vld [vmem:[#allocation2 + $0x10] sm:$0xff]  ;;  %v3036_v44 = vld [vmem:[#allocation2 + $0xa0] sm:$0xff]  ;;  %s2890_s27 = scalar_lea.vmem %s1977_s1, 256  ;;  %p2895_p9 = scmp.lt.s32.totalorder %s1977_s1, %s1977_s1 }
  0x17   :  { %v188_v17 = vand.u32 4294901760, %v2967_v12  ;;  %v2975_v19 = vld [vmem:[#allocation2 + $0x18] sm:$0xff]  ;;  %40 = vperm.xlu0 %2867, %v32_v14   ;;  %v2978_v20 = vsub.f32 %v2959_v3, %v182_v8  ;;  %v2980_v21 = vsub.f32 %v86_v6, %v185_v9  ;;  %v191_v23 = vand.u32 4294901760, %v2969_v13  ;;  %v3038_v45 = vld [vmem:[#allocation2 + $0xa8] sm:$0xff]  ;;  %v3049_v54 = vld [vmem:[#allocation2 + $0x20] sm:$0xff]  ;;  %p2891_p8 = scmp.ne.s32.totalorder %s1977_s1, %s2890_s27  ;;  %p2896_p10 = scmp.lt.s32.totalorder %s2890_s27, %s2890_s27 }
  0x18   :  { %v2985_v22 = vsub.f32 %v2961_v7, %v134_v11  ;;  %v2989_v24 = vsub.f32 %v2964_v10, %v137_v16  ;;  %v140_v26 = vand.u32 4294901760, %v2973_v18  ;;  %v143_v27 = vand.u32 4294901760, %v2975_v19  ;;  %v3053_v59 = vld [vmem:[#allocation2 + $0x28] sm:$0xff]  ;;  %v3055_v60 = vld [vmem:[#allocation2 + $0xb0] sm:$0xff]  ;;  %v3059_v1 = vld [vmem:[#allocation2 + $0xb8] sm:$0xff] }
  0x19   :  { %v2994_v25 = vsub.f32 %v2967_v12, %v188_v17  ;;  %v4508_v28 = vand.u32 4294901760, %v2978_v20  ;;  %v4506_v29 = vand.u32 4294901760, %v2980_v21  ;;  %v3004_v31 = vsub.f32 %v2969_v13, %v191_v23  ;;  %v3072_v6 = vld [vmem:[#allocation2 + $0x30] sm:$0xff]  ;;  %p2897_p11 = por %p2896_p10, %p2895_p9 }
  0x1a   :  { %v4504_v30 = vand.u32 4294901760, %v2985_v22  ;;  %v4502_v32 = vand.u32 4294901760, %v2989_v24  ;;  %v3011_v34 = vsub.f32 %v2973_v18, %v140_v26  ;;  %v3016_v35 = vsub.f32 %v2975_v19, %v143_v27 }
  0x1b   :  { %v4501_v33 = vand.u32 4294901760, %v2994_v25  ;;  %43 = vperm.xlu0 %2867, %v33_v15   ;;  %v376_v36 = vsub.f32 %v2978_v20, %v4508_v28  ;;  %v383_v37 = vsub.f32 %v2980_v21, %v4506_v29  ;;  %v4500_v39 = vand.u32 4294901760, %v3004_v31  ;;  %v3282_v28 = vld [vmem:[#allocation2 + $0x60] sm:$0xff]  ;;  %p2898_p12 = pnand %p2897_p11, %p2891_p8 }
  0x1c   :  { %v264_v38 = vsub.f32 %v2985_v22, %v4504_v30  ;;  %v271_v40 = vsub.f32 %v2989_v24, %v4502_v32  ;;  %v4497_v42 = vand.u32 4294901760, %v3011_v34  ;;  %v4496_v43 = vand.u32 4294901760, %v3016_v35 }
  0x1d   :  { %v390_v41 = vsub.f32 %v2994_v25, %v4501_v33  ;;  %v377_v46 = vand.u32 4294901760, %v376_v36  ;;  %v384_v47 = vand.u32 4294901760, %v383_v37  ;;  %v397_v49 = vsub.f32 %v3004_v31, %v4500_v39  ;;  %v3256_v33 = vld [vmem:[#allocation2 + $0xe0] sm:$0xff] }
  0x1e   :  { %v265_v48 = vand.u32 4294901760, %v264_v38  ;;  %v272_v50 = vand.u32 4294901760, %v271_v40  ;;  %v278_v52 = vsub.f32 %v3011_v34, %v4497_v42  ;;  %v285_v53 = vsub.f32 %v3016_v35, %v4496_v43  ;;  %v3089_v40 = vld [vmem:[#allocation2 + $0x38] sm:$0xff] }
  0x1f   :  { %v391_v51 = vand.u32 4294901760, %v390_v41  ;;  %v2508_v55 = vpack.c.bf16 %v384_v47, %v377_v46  ;;  %v398_v56 = vand.u32 4294901760, %v397_v49  ;;  %v194_v57 = vand.u32 4294901760, %v3036_v44 }
  0x20   :  { %v197_v58 = vand.u32 4294901760, %v3038_v45  ;;  %v2510_v61 = vpack.c.bf16 %v272_v50, %v265_v48  ;;  %v279_v62 = vand.u32 4294901760, %v278_v52  ;;  %v286_v63 = vand.u32 4294901760, %v285_v53 }
  0x21   :  { %v3057_v0 = vpack.c.bf16 %v185_v9, %v182_v8  ;;  %2509 = vmatprep.subr.bf16.mxu1 %v2508_v55  ;;  %v2512_v2 = vpack.c.bf16 %v398_v56, %v391_v51  ;;  %v3064_v3 = vsub.f32 %v3036_v44, %v194_v57  ;;  %v146_v5 = vand.u32 4294901760, %v3049_v54 }
  0x22   :  { %v3069_v4 = vsub.f32 %v3038_v45, %v197_v58  ;;  %2511 = vmatpush3.bf16.msra.mxu1 %v2510_v61  ;;  %v2514_v8 = vpack.c.bf16 %v286_v63, %v279_v62  ;;  %v149_v9 = vand.u32 4294901760, %v3053_v59  ;;  %v3078_v10 = vpack.c.bf16 %v137_v16, %v134_v11  ;;  %v3146_v63 = vld [vmem:[#allocation2 + $0xc0] sm:$0xff] }
  0x23   :  { %2477 = vmatprep.subr.bf16.mxu0 %v3057_v0  ;;  %v200_v14 = vand.u32 4294901760, %v3055_v60  ;;  %2513 = vmatprep.subr.bf16.mxu1 %v2512_v2  ;;  %v4492_v15 = vand.u32 4294901760, %v3064_v3  ;;  %v3086_v37 = vsub.f32 %v3049_v54, %v146_v5  ;;  %v203_v38 = vand.u32 4294901760, %v3059_v1  ;;  %v3148_v2 = vld [vmem:[#allocation2 + $0xc8] sm:$0xff]  ;;  %v3218_v54 = vld [vmem:[#allocation2 + $0x58] sm:$0xff] }
  0x24   :  { %v4491_v36 = vand.u32 4294901760, %v3069_v4  ;;  %v3094_v7 = vsub.f32 %v3053_v59, %v149_v9  ;;  %2479 = vmatpush3.bf16.msra.mxu0 %v3078_v10  ;;  %v3106_v16 = vpack.c.bf16 %v191_v23, %v188_v17  ;;  %v152_v41 = vand.u32 4294901760, %v3072_v6 }
  0x25   :  { %v3100_v11 = vsub.f32 %v3055_v60, %v200_v14  ;;  %v404_v46 = vsub.f32 %v3064_v3, %v4492_v15  ;;  %v4490_v48 = vand.u32 4294901760, %v3086_v37  ;;  %v3119_v12 = vsub.f32 %v3059_v1, %v203_v38 }
  0x26   :  { %v411_v47 = vsub.f32 %v3069_v4, %v4491_v36  ;;  %2515 = vmatpush3.bf16.msra.mxu1 %v2514_v8  ;;  %v4489_v13 = vand.u32 4294901760, %v3094_v7  ;;  %2481 = vmatprep.subr.bf16.mxu0 %v3106_v16  ;;  %v155_v23 = vand.u32 4294901760, %v3089_v40  ;;  %v3128_v49 = vsub.f32 %v3072_v6, %v152_v41 }
  0x27   :  { %v4488_v17 = vand.u32 4294901760, %v3100_v11  ;;  %v405_v50 = vand.u32 4294901760, %v404_v46  ;;  %v292_v52 = vsub.f32 %v3086_v37, %v4490_v48  ;;  %v4494_v53 = vand.u32 4294901760, %v3119_v12 }
  0x28   :  { %v412_v51 = vand.u32 4294901760, %v411_v47  ;;  %v299_v55 = vsub.f32 %v3094_v7, %v4489_v13  ;;  %v4493_v61 = vand.u32 4294901760, %v3128_v49  ;;  %v3144_v62 = vsub.f32 %v3089_v40, %v155_v23  ;;  %v3159_v13 = vld [vmem:[#allocation2 + $0x40] sm:$0xff] }
  0x29   :  { %v418_v56 = vsub.f32 %v3100_v11, %v4488_v17  ;;  %v293_v46 = vand.u32 4294901760, %v292_v52  ;;  %v425_v47 = vsub.f32 %v3119_v12, %v4494_v53  ;;  %v3157_v17 = vpack.c.bf16 %v143_v27, %v140_v26  ;;  %v3176_v27 = vld [vmem:[#allocation2 + $0xd0] sm:$0xff] }
  0x2a   :  { %v2516_v8 = vpack.c.bf16 %v412_v51, %v405_v50  ;;  %v300_v48 = vand.u32 4294901760, %v299_v55  ;;  %v306_v15 = vsub.f32 %v3128_v49, %v4493_v61  ;;  %v4495_v50 = vand.u32 4294901760, %v3144_v62  ;;  %v3165_v51 = vld [vmem:[#allocation2 + $0x48] sm:$0xff]  ;;  %v3182_v61 = vld [vmem:[#allocation2 + $0xd8] sm:$0xff] }
  0x2b   :  { %v419_v36 = vand.u32 4294901760, %v418_v56  ;;  %v426_v52 = vand.u32 4294901760, %v425_v47  ;;  %2483 = vmatpush3.bf16.msra.mxu0 %v3157_v17  ;;  %v206_v18 = vand.u32 4294901760, %v3146_v63  ;;  %v209_v19 = vand.u32 4294901760, %v3148_v2 }
  0x2c   :  { %2517 = vmatprep.subr.bf16.mxu1 %v2516_v8  ;;  %v3174_v26 = vpack.c.bf16 %v197_v58, %v194_v57  ;;  %v2518_v55 = vpack.c.bf16 %v300_v48, %v293_v46  ;;  %v307_v56 = vand.u32 4294901760, %v306_v15  ;;  %v313_v8 = vsub.f32 %v3144_v62, %v4495_v50  ;;  %v3216_v50 = vld [vmem:[#allocation2 + $0x50] sm:$0xff] }
  0x2d   :  { %v158_v47 = vand.u32 4294901760, %v3159_v13  ;;  %v2520_v53 = vpack.c.bf16 %v426_v52, %v419_v36  ;;  %v3187_v44 = vsub.f32 %v3146_v63, %v206_v18  ;;  %v3192_v45 = vsub.f32 %v3148_v2, %v209_v19  ;;  %v99_v63 = vld [vmem:[#allocation2 + $0xf0] sm:$0xff] }
  0x2e   :  { %2485 = vmatprep.subr.bf16.mxu0 %v3174_v26  ;;  %v161_v57 = vand.u32 4294901760, %v3165_v51  ;;  %2519 = vmatpush3.bf16.msra.mxu1 %v2518_v55  ;;  %v314_v58 = vand.u32 4294901760, %v313_v8  ;;  %v3205_v36 = vpack.c.bf16 %v149_v9, %v146_v5  ;;  %v212_v48 = vand.u32 4294901760, %v3176_v27 }
  0x2f   :  { %v3199_v15 = vsub.f32 %v3159_v13, %v158_v47  ;;  %2521 = vmatprep.subr.bf16.mxu1 %v2520_v53  ;;  %v4499_v46 = vand.u32 4294901760, %v3187_v44  ;;  %v4498_v52 = vand.u32 4294901760, %v3192_v45  ;;  %v4511_v8 = vand.u32 4294901760, %v3182_v61 }
  0x30   :  { %v3213_v55 = vsub.f32 %v3165_v51, %v161_v57  ;;  %v2522_v59 = vpack.c.bf16 %v314_v58, %v307_v56  ;;  %2487 = vmatpush3.bf16.msra.mxu0 %v3205_v36  ;;  %v3225_v9 = vsub.f32 %v3176_v27, %v212_v48  ;;  %v3231_v53 = vpack.c.bf16 %v203_v38, %v200_v14  ;;  %v83_v51 = vld [vmem:[#allocation2 + $0x70] sm:$0xff] }
  0x31   :  { %v4503_v5 = vand.u32 4294901760, %v3199_v15  ;;  %v432_v43 = vsub.f32 %v3187_v44, %v4499_v46  ;;  %v439_v56 = vsub.f32 %v3192_v45, %v4498_v52  ;;  %v3243_v42 = vsub.f32 %v3182_v61, %v4511_v8 }
  0x32   :  { %4623 = vst [vmem:[#allocation8_spill] sm:$0xff] %v3231_v53  ;;  %v4505_v58 = vand.u32 4294901760, %v3213_v55  ;;  %2523 = vmatpush3.bf16.msra.mxu1 %v2522_v59  ;;  %v4507_v1 = vand.u32 4294901760, %v3225_v9  ;;  %2489 = vmatprep.subr.bf16.mxu0 %v3231_v53  ;;  %v4509_v14 = vand.u32 4294901760, %v3216_v50  ;;  %v4510_v38 = vand.u32 4294901760, %v3218_v54 }
  0x33   :  { %v320_v60 = vsub.f32 %v3199_v15, %v4503_v5  ;;  %v433_v52 = vand.u32 4294901760, %v432_v43  ;;  %v440_v46 = vand.u32 4294901760, %v439_v56  ;;  %v4512_v59 = vand.u32 4294901760, %v3243_v42  ;;  %v3271_v56 = vld [vmem:[#allocation2 + $0xe8] sm:$0xff] }
  0x34   :  { %v327_v39 = vsub.f32 %v3213_v55, %v4505_v58  ;;  %v446_v5 = vsub.f32 %v3225_v9, %v4507_v1  ;;  %v3264_v30 = vsub.f32 %v3216_v50, %v4509_v14  ;;  %v3269_v43 = vsub.f32 %v3218_v54, %v4510_v38 }
  0x35   :  { %v321_v32 = vand.u32 4294901760, %v320_v60  ;;  %v2524_v58 = vpack.c.bf16 %v440_v46, %v433_v52  ;;  %v453_v60 = vsub.f32 %v3243_v42, %v4512_v59  ;;  %v3280_v1 = vpack.c.bf16 %v155_v23, %v152_v41 }
  0x36   :  { %v328_v29 = vand.u32 4294901760, %v327_v39  ;;  %v447_v14 = vand.u32 4294901760, %v446_v5  ;;  %v4514_v38 = vand.u32 4294901760, %v3264_v30  ;;  %v4513_v8 = vand.u32 4294901760, %v3269_v43  ;;  %v3287_v39 = vld [vmem:[#allocation2 + $0x68] sm:$0xff]  ;;  %v100_v5 = vld [vmem:[#allocation2 + $0xf8] sm:$0xff] }
  0x37   :  { %4624 = vst [vmem:[#allocation9_spill] sm:$0xff] %v3280_v1  ;;  %v4515_v46 = vand.u32 4294901760, %v3256_v33  ;;  %2525 = vmatprep.subr.bf16.mxu1 %v2524_v58  ;;  %v454_v59 = vand.u32 4294901760, %v453_v60  ;;  %2491 = vmatpush3.bf16.msra.mxu0 %v3280_v1  ;;  %v221_v6 = vand.u32 4294901760, %v3271_v56  ;;  %v3295_v40 = vpack.c.bf16 %v209_v19, %v206_v18 }
  0x38   :  { %v2526_v52 = vpack.c.bf16 %v328_v29, %v321_v32  ;;  %v334_v41 = vsub.f32 %v3264_v30, %v4514_v38  ;;  %v341_v23 = vsub.f32 %v3269_v43, %v4513_v8  ;;  %v170_v32 = vand.u32 4294901760, %v3282_v28 }
  0x39   :  { %4625 = vst [vmem:[#allocation10_spill] sm:$0xff] %v3295_v40  ;;  %v3306_v29 = vsub.f32 %v3256_v33, %v4515_v46  ;;  %v2528_v2 = vpack.c.bf16 %v454_v59, %v447_v14  ;;  %v3310_v18 = vsub.f32 %v3271_v56, %v221_v6  ;;  %2493 = vmatprep.subr.bf16.mxu0 %v3295_v40  ;;  %v173_v19 = vand.u32 4294901760, %v3287_v39 }
  0x3a   :  { %2527 = vmatpush3.bf16.msra.mxu1 %v2526_v52  ;;  %v3318_v58 = vpack.c.bf16 %v161_v57, %v158_v47  ;;  %v335_v60 = vand.u32 4294901760, %v334_v41  ;;  %v342_v8 = vand.u32 4294901760, %v341_v23  ;;  %v3322_v52 = vsub.f32 %v3282_v28, %v170_v32  ;;  %v84_v47 = vld [vmem:[#allocation2 + $0x78] sm:$0xff] }
  0x3b   :  { %v4519_v38 = vand.u32 4294901760, %v3306_v29  ;;  %2529 = vmatprep.subr.bf16.mxu1 %v2528_v2  ;;  %v4518_v14 = vand.u32 4294901760, %v3310_v18  ;;  %v3326_v59 = vsub.f32 %v3287_v39, %v173_v19  ;;  %v224_v13 = vand.u32 4294901760, %v99_v63 }
  0x3c   :  { %4626 = vst [vmem:[#allocation11_spill] sm:$0xff] %v3318_v58  ;;  %2495 = vmatpush3.bf16.msra.mxu0 %v3318_v58  ;;  %v227_v56 = vand.u32 4294901760, %v100_v5  ;;  %v2530_v57 = vpack.c.bf16 %v342_v8, %v335_v60  ;;  %v4520_v28 = vand.u32 4294901760, %v3322_v52  ;;  %v4627_v23 = vand.u32 4294901760, %v3182_v61 }
  0x3d   :  { %v460_v41 = vsub.f32 %v3306_v29, %v4519_v38  ;;  %v467_v39 = vsub.f32 %v3310_v18, %v4518_v14  ;;  %v4527_v46 = vand.u32 4294901760, %v3326_v59  ;;  %v3343_v58 = vsub.f32 %v99_v63, %v224_v13 }
  0x3e   :  { %v3337_v2 = vpack.c.bf16 %v4627_v23, %v212_v48  ;;  %v3345_v8 = vsub.f32 %v100_v5, %v227_v56  ;;  %2531 = vmatpush3.bf16.msra.mxu1 %v2530_v57  ;;  %v348_v27 = vsub.f32 %v3322_v52, %v4520_v28  ;;  %v176_v61 = vand.u32 4294901760, %v83_v51 }
  0x3f   :  { %v461_v60 = vand.u32 4294901760, %v460_v41  ;;  %v179_v48 = vand.u32 4294901760, %v84_v47  ;;  %v468_v23 = vand.u32 4294901760, %v467_v39  ;;  %v355_v14 = vsub.f32 %v3326_v59, %v4527_v46 }
  0x40   :  { %4628 = vst [vmem:[#allocation12_spill] sm:$0xff] %v3337_v2  ;;  %2497 = vmatprep.subr.bf16.mxu0 %v3337_v2  ;;  %v4528_v63 = vand.u32 4294901760, %v3343_v58  ;;  %v4529_v5 = vand.u32 4294901760, %v3345_v8  ;;  %v349_v38 = vand.u32 4294901760, %v348_v27  ;;  %v3356_v57 = vsub.f32 %v83_v51, %v176_v61 }
  0x41   :  { %v3358_v41 = vsub.f32 %v84_v47, %v179_v48  ;;  %v4629_v28 = vand.u32 4294901760, %v3216_v50  ;;  %v4630_v2 = vand.u32 4294901760, %v3218_v54  ;;  %v2532_v39 = vpack.c.bf16 %v468_v23, %v461_v60 }
  0x42   :  { %v356_v1 = vand.u32 4294901760, %v355_v14  ;;  %v474_v46 = vsub.f32 %v3343_v58, %v4528_v63  ;;  %v481_v27 = vsub.f32 %v3345_v8, %v4529_v5  ;;  %v361_v51 = vand.u32 4294901760, %v3356_v57 }
  0x43   :  { %v3364_v40 = vpack.c.bf16 %v4630_v2, %v4629_v28  ;;  %v368_v47 = vand.u32 4294901760, %v3358_v41  ;;  %2533 = vmatprep.subr.bf16.mxu1 %v2532_v39  ;;  %v4631_v14 = vand.u32 4294901760, %v3256_v33  ;;  %v3381_v63 = vpack.c.bf16 %v173_v19, %v170_v32 }
  0x44   :  { %v2534_v50 = vpack.c.bf16 %v356_v1, %v349_v38  ;;  %v475_v54 = vand.u32 4294901760, %v474_v46  ;;  %v482_v28 = vand.u32 4294901760, %v481_v27  ;;  %v362_v60 = vsub.f32 %v3356_v57, %v361_v51 }
  0x45   :  { %2499 = vmatpush3.bf16.msra.mxu0 %v3364_v40  ;;  %v3377_v2 = vpack.c.bf16 %v221_v6, %v4631_v14  ;;  %v369_v23 = vsub.f32 %v3358_v41, %v368_v47  ;;  %v3383_v5 = vpack.c.bf16 %v227_v56, %v224_v13  ;;  %v3386_v39 = vpack.c.bf16 %v179_v48, %v176_v61 }
  0x46   :  { %2535 = vmatpush3.bf16.msra.mxu1 %v2534_v50  ;;  %v2536_v53 = vpack.c.bf16 %v482_v28, %v475_v54  ;;  %v2540_v1 = vpack.c.bf16 %v2980_v21, %v2978_v20  ;;  %v363_v33 = vand.u32 4294901760, %v362_v60  ;;  %v4635_v54 = vand.u32 4294901760, %v2989_v24 }
  0x47   :  { %2501 = vmatprep.subr.bf16.mxu0 %v3377_v2  ;;  %v370_v38 = vand.u32 4294901760, %v369_v23  ;;  %v4636_v60 = vand.u32 4294901760, %v2994_v25  ;;  %v4637_v50 = vand.u32 4294901760, %v3004_v31 }
  0x48   :  { %2537 = vmatprep.subr.bf16.mxu1 %v2536_v53 }
  0x49   :  { %2503 = vmatpush3.bf16.msra.mxu0 %v3381_v63  ;;  %v2538_v56 = vpack.c.bf16 %v370_v38, %v363_v33  ;;  %v4632_v33 = vand.u32 4294901760, %v2978_v20  ;;  %v4633_v38 = vand.u32 4294901760, %v2980_v21  ;;  %v3440_v23 = vpack.c.bf16 %v4637_v50, %v4636_v60 }
  0x4a   :  { %2505 = vmatprep.subr.bf16.mxu0 %v3383_v5  ;;  %v4639_v20 = vand.u32 4294901760, %v3016_v35  ;;  %v4640_v21 = vand.u32 4294901760, %v3064_v3  ;;  %v4645_v50 = vand.u32 4294901760, %v3100_v11  ;;  %v4646_v60 = vand.u32 4294901760, %v3119_v12 }
  0x4b   :  { %2539 = vmatpush3.bf16.msra.mxu1 %v2538_v56  ;;  %v3428_v28 = vpack.c.bf16 %v4633_v38, %v4632_v33  ;;  %v4634_v56 = vand.u32 4294901760, %v2985_v22  ;;  %v4641_v33 = vand.u32 4294901760, %v3069_v4 }
  0x4c   :  { %2573 = vmatprep.subr.bf16.mxu1 %v3057_v0  ;;  %v3464_v48 = vpack.c.bf16 %v4646_v60, %v4645_v50  ;;  %v4657_v50 = vand.u32 4294901760, %v3225_v9  ;;  %v4658_v60 = vand.u32 4294901760, %v3243_v42 }
  0x4d   :  { %2507 = vmatpush3.bf16.msra.mxu0 %v3386_v39  ;;  %v3434_v14 = vpack.c.bf16 %v4635_v54, %v4634_v56  ;;  %v3452_v38 = vpack.c.bf16 %v4641_v33, %v4640_v21  ;;  %v4642_v54 = vand.u32 4294901760, %v3086_v37  ;;  %v4643_v56 = vand.u32 4294901760, %v3094_v7 }
  0x4e   :  { %2541 = vmatprep.subr.bf16.mxu0 %v2540_v1  ;;  %v4638_v1 = vand.u32 4294901760, %v3011_v34  ;;  %4647 = vst [vmem:[#allocation14_spill] sm:$0xff] %v3464_v48  ;;  %v4651_v21 = vand.u32 4294901760, %v3187_v44  ;;  %v4652_v33 = vand.u32 4294901760, %v3192_v45  ;;  %v3488_v32 = vpack.c.bf16 %v4658_v60, %v4657_v50 }
  0x4f   :  { %v3458_v53 = vpack.c.bf16 %v4643_v56, %v4642_v54  ;;  %v4654_v54 = vand.u32 4294901760, %v3199_v15  ;;  %v4655_v56 = vand.u32 4294901760, %v3213_v55  ;;  %v4669_v50 = vand.u32 4294901760, %v3343_v58 }
  0x50   :  { %v3446_v27 = vpack.c.bf16 %v4639_v20, %v4638_v1  ;;  %v4648_v1 = vand.u32 4294901760, %v3128_v49  ;;  %v4649_v20 = vand.u32 4294901760, %v3144_v62  ;;  %v3476_v13 = vpack.c.bf16 %v4652_v33, %v4651_v21  ;;  %4659 = vst [vmem:[#allocation18_spill] sm:$0xff] %v3488_v32 }
  0x51   :  { %4644 = vst [vmem:[#allocation13_spill] sm:$0xff] %v3458_v53  ;;  %v3482_v19 = vpack.c.bf16 %v4655_v56, %v4654_v54  ;;  %v4663_v21 = vand.u32 4294901760, %v3306_v29  ;;  %v4664_v33 = vand.u32 4294901760, %v3310_v18  ;;  %v4666_v54 = vand.u32 4294901760, %v3322_v52  ;;  %v4680_v53 = vld [vmem:[#allocation9_spill] sm:$0xff] }
  0x52   :  { %v3470_v61 = vpack.c.bf16 %v4649_v20, %v4648_v1  ;;  %4653 = vst [vmem:[#allocation16_spill] sm:$0xff] %v3476_v13  ;;  %v4660_v1 = vand.u32 4294901760, %v3264_v30  ;;  %v4661_v20 = vand.u32 4294901760, %v3269_v43  ;;  %v4667_v56 = vand.u32 4294901760, %v3326_v59 }
  0x53   :  { %4656 = vst [vmem:[#allocation17_spill] sm:$0xff] %v3482_v19  ;;  %v3500_v46 = vpack.c.bf16 %v4664_v33, %v4663_v21  ;;  %v4670_v60 = vand.u32 4294901760, %v3345_v8 }
  0x54   :  { %4650 = vst [vmem:[#allocation15_spill] sm:$0xff] %v3470_v61  ;;  %v3494_v6 = vpack.c.bf16 %v4661_v20, %v4660_v1  ;;  %v3506_v19 = vpack.c.bf16 %v4667_v56, %v4666_v54  ;;  %v3514_v1 = vpack.c.bf16 %v368_v47, %v361_v51  ;;  %v34_v20 = vlaneseq }
  0x55   :  { %4665 = vst [vmem:[#allocation20_spill] sm:$0xff] %v3500_v46  ;;  %v3512_v32 = vpack.c.bf16 %v4670_v60, %v4669_v50  ;;  %v4534_v54 = vmov 0.0   ;;  %v4532_v47 = vmov 1.0  }
  0x56   :  { %4662 = vst [vmem:[#allocation19_spill] sm:$0xff] %v3494_v6  ;;  %4668 = vst [vmem:[#allocation21_spill] sm:$0xff] %v3506_v19  ;;  %v3516_v6 = vand.u32 127, %v34_v20 }
  0x57   :  { %4671 = vst [vmem:[#allocation22_spill] sm:$0xff] %v3512_v32  ;;  %4672 = vst [vmem:[#allocation23_spill] sm:$0xff] %v3514_v1  ;;  %v4675_v1 = vmov 1.0  }
  0x58   :  { %4673 = vst [vmem:[#allocation24_spill] sm:$0xff] %v3516_v6  ;;  %v3519_v21 = vadd.s32 128, %v3516_v6 }
  0x96   :  { %v3521_v33 = vpop.permute.xlu0 %40 }
  0x97   :  { %vm46_vm2 = vcmp.eq.s32.totalorder %v3519_v21, %v3521_v33  ;;  %vm45_vm3 = vcmp.eq.s32.totalorder %v3516_v6, %v3521_v33 }
  0x98   :  { %v1989_v51 = vsel %vm46_vm2, 1.0, %v4534_v54  ;;  %1996 = vmatprep.mubr.msk.f32.mxu1 %vm46_vm2, %v4532_v47  ;;  %v1988_v56 = vsel %vm45_vm3, 1.0, %v4534_v54 }
  0x99   :  { %v230_v50 = vsub.f32 %v1989_v51, %v1989_v51  ;;  %v3539_v60 = vsub.f32 %v1988_v56, %v1988_v56  ;;  %1997 = vmatmul.mubr.msk.f32.vlgmr.msra.gmra.mrb[0].mxu1 %vm45_vm3, %v4532_v47 }
  0x9a   :  { %2575 = vmatpush3.bf16.msra.mxu1 %v3078_v10  ;;  %v3546_v20 = vpop.permute.xlu0 %43 }
  0x9b   :  { %4674 = vst [vmem:[#allocation25_spill] sm:$0xff] %v3546_v20  ;;  %vm50_vm4 = vcmp.eq.s32.totalorder %v3519_v21, %v3546_v20  ;;  %2577 = vmatprep.subr.bf16.mxu1 %v3106_v16  ;;  %vm49_vm5 = vcmp.eq.s32.totalorder %v3516_v6, %v3546_v20  ;;  %v231_v51 = vand.u32 4294901760, %v230_v50  ;;  %v4676_v13 = vand.u32 4294901760, %v3539_v60 }
  0x9c   :  { %v1993_v47 = vsel %vm50_vm4, 1.0, %v4534_v54  ;;  %1998 = vmatprep.mubr.msk.f32.mxu1 %vm50_vm4, %v4675_v1  ;;  %v1992_v32 = vsel %vm49_vm5, 1.0, %v4534_v54 }
  0x9d   :  { %v3566_v19 = vsub.f32 %v1993_v47, %v1993_v47  ;;  %v3568_v46 = vsub.f32 %v1992_v32, %v1992_v32  ;;  %1999 = vmatmul.mubr.msk.f32.gmra.mrb[2].mxu1 %vm49_vm5, %v4675_v1  ;;  %v232_v56 = vsub.f32 %v230_v50, %v231_v51  ;;  %v238_v61 = vsub.f32 %v3539_v60, %v4676_v13 }
  0x9e   :  { %2579 = vmatpush3.bf16.msra.mxu1 %v3157_v17  ;;  %745 = vmatprep.mubr.f32.mxu1 %v231_v51  ;;  %v4677_v13 = vpack.c.bf16 %v2989_v24, %v2985_v22  ;;  %v4678_v51 = vld [vmem:[#allocation8_spill] sm:$0xff]  ;;  %v4683_v22 = vpack.c.bf16 %v3069_v4, %v3064_v3  ;;  %v4684_v24 = vld [vmem:[#allocation11_spill] sm:$0xff]  ;;  %v3619_v4 = vld [vmem:[#allocation2 + $0x178] sm:$0xff] }
  0x9f   :  { %2581 = vmatprep.subr.bf16.mxu1 %v3174_v26  ;;  %v233_v54 = vand.u32 4294901760, %v232_v56  ;;  %v239_v47 = vand.u32 4294901760, %v238_v61  ;;  %v246_v32 = vand.u32 4294901760, %v3566_v19  ;;  %v4540_v48 = vand.u32 4294901760, %v3568_v46  ;;  %v3617_v3 = vld [vmem:[#allocation2 + $0x170] sm:$0xff]  ;;  %4691 = vst [vmem:[#allocation9_spill] sm:$0xff] %v3619_v4 }
  0xa0   :  { %4690 = vst [vmem:[#allocation8_spill] sm:$0xff] %v3617_v3 }
  0xa1   :  { %234 = vmatprep.mubr.f32.mxu0 %v233_v54  ;;  %v247_v20 = vsub.f32 %v3566_v19, %v246_v32  ;;  %v253_v6 = vsub.f32 %v3568_v46, %v4540_v48  ;;  %v4679_v54 = vpack.c.bf16 %v3004_v31, %v2994_v25  ;;  %v4681_v48 = vpack.c.bf16 %v3016_v35, %v3011_v34  ;;  %v4686_v31 = vld [vmem:[#allocation12_spill] sm:$0xff] }
  0xa2   :  { %2583 = vmatpush3.bf16.msra.mxu1 %v3205_v36  ;;  %240 = vmatmul.mubr.f32.vlgmr.msra.gmra.mrb[0].mxu0 %v239_v47  ;;  %v4682_v47 = vld [vmem:[#allocation10_spill] sm:$0xff]  ;;  %v4685_v25 = vpack.c.bf16 %v3094_v7, %v3086_v37  ;;  %v4688_v34 = vpack.c.bf16 %v3144_v62, %v3128_v49  ;;  %v4689_v35 = vpack.c.bf16 %v3192_v45, %v3187_v44  ;;  %v3633_v62 = vld [vmem:[#allocation2 + $0x188] sm:$0xff] }
  0xa3   :  { %2543 = vmatpush3.bf16.msra.mxu0 %v4677_v13  ;;  %2585 = vmatprep.subr.bf16.mxu1 %v4678_v51  ;;  %v248_v61 = vand.u32 4294901760, %v247_v20  ;;  %v254_v56 = vand.u32 4294901760, %v253_v6  ;;  %v4687_v6 = vpack.c.bf16 %v3119_v12, %v3100_v11  ;;  %v4692_v37 = vpack.c.bf16 %v3213_v55, %v3199_v15  ;;  %v3626_v7 = vld [vmem:[#allocation2 + $0x180] sm:$0xff]  ;;  %v3637_v45 = vld [vmem:[#allocation2 + $0x108] sm:$0xff]  ;;  %v3641_v55 = vld [vmem:[#allocation2 + $0x190] sm:$0xff] }
  0xa4   :  { %2545 = vmatprep.subr.bf16.mxu0 %v4679_v54  ;;  %v4542_v11 = vand.u32 4294901760, %v3617_v3  ;;  %v4541_v12 = vand.u32 4294901760, %v3619_v4  ;;  %v4693_v49 = vpack.c.bf16 %v3243_v42, %v3225_v9  ;;  %v3635_v44 = vld [vmem:[#allocation2 + $0x100] sm:$0xff]  ;;  %v4563_v15 = vand.u32 4294901760, %v3626_v7  ;;  %v3647_v42 = vld [vmem:[#allocation2 + $0x198] sm:$0xff]  ;;  %v3665_v13 = vld [vmem:[#allocation2 + $0x110] sm:$0xff] }
  0xa5   :  { %249 = vmatprep.mubr.f32.mxu0 %v248_v61  ;;  %v4695_v20 = vpack.c.bf16 %v3310_v18, %v3306_v29  ;;  %v3667_v61 = vld [vmem:[#allocation2 + $0x118] sm:$0xff]  ;;  %v4548_v54 = vand.u32 4294901760, %v3641_v55  ;;  %v4547_v18 = vand.u32 4294901760, %v3647_v42 }
  0xa6   :  { %2587 = vmatpush3.bf16.msra.mxu1 %v4680_v53  ;;  %255 = vmatmul.mubr.f32.gmra.mrb[2].mxu0 %v254_v56  ;;  %v3652_v9 = vsub.f32 %v3617_v3, %v4542_v11  ;;  %v4696_v56 = vand.u32 4294901760, %v3539_v60  ;;  %v3676_v29 = vsub.f32 %v3626_v7, %v4563_v15  ;;  %v3751_v11 = vld [vmem:[#allocation2 + $0x128] sm:$0xff] }
  0xa7   :  { %2547 = vmatpush3.bf16.msra.mxu0 %v4681_v48  ;;  %629 = vmatprep.mubr.f32.mxu0 %v230_v50  ;;  %v4694_v48 = vpack.c.bf16 %v3269_v43, %v3264_v30  ;;  %v3657_v50 = vsub.f32 %v3619_v4, %v4541_v12  ;;  %v4554_v30 = vand.u32 4294901760, %v3633_v62  ;;  %v4549_v43 = vand.u32 4294901760, %v3637_v45 }
  0xa8   :  { %2589 = vmatprep.subr.bf16.mxu1 %v4682_v47  ;;  %2549 = vmatprep.subr.bf16.mxu0 %v4683_v22  ;;  %4697 = vst [vmem:[#allocation10_spill] sm:$0xff] %v3676_v29  ;;  %v3679_v22 = vld [vmem:[#allocation2 + $0x1a0] sm:$0xff] }
  0xaa   :  { %2591 = vmatpush3.bf16.msra.mxu1 %v4684_v24 }
  0xab   :  { %2551 = vmatpush3.bf16.msra.mxu0 %v4685_v25  ;;  %2593 = vmatprep.subr.bf16.mxu1 %v4686_v31  ;;  %v3681_v25 = vld [vmem:[#allocation2 + $0x1a8] sm:$0xff] }
  0xac   :  { %2553 = vmatprep.subr.bf16.mxu0 %v4687_v6  ;;  %v4698_v6 = vpack.c.bf16 %v3326_v59, %v3322_v52  ;;  %v3707_v52 = vsub.f32 %v3637_v45, %v4549_v43  ;;  %v4703_v59 = vand.u32 4294901760, %v3568_v46 }
  0xae   :  { %2595 = vmatpush3.bf16.msra.mxu1 %v3364_v40  ;;  %4702 = vst [vmem:[#allocation26_spill] sm:$0xff] %v3707_v52 }
  0xaf   :  { %2555 = vmatpush3.bf16.msra.mxu0 %v4688_v34  ;;  %2597 = vmatprep.subr.bf16.mxu1 %v3377_v2  ;;  %v4544_v34 = vand.u32 4294901760, %v3652_v9 }
  0xb0   :  { %2557 = vmatprep.subr.bf16.mxu0 %v4689_v35  ;;  %v4543_v35 = vand.u32 4294901760, %v3657_v50 }
  0xb2   :  { %2599 = vmatpush3.bf16.msra.mxu1 %v3381_v63 }
  0xb3   :  { %2559 = vmatpush3.bf16.msra.mxu0 %v4692_v37  ;;  %2601 = vmatprep.subr.bf16.mxu1 %v3383_v5  ;;  %v4699_v37 = vpack.c.bf16 %v3345_v8, %v3343_v58  ;;  %v3714_v58 = vsub.f32 %v3641_v55, %v4548_v54  ;;  %v4551_v8 = vand.u32 4294901760, %v3679_v22  ;;  %v4561_v54 = vand.u32 4294901760, %v3751_v11 }
  0xb4   :  { %2561 = vmatprep.subr.bf16.mxu0 %v4693_v49  ;;  %v3697_v49 = vsub.f32 %v3633_v62, %v4554_v30 }
  0xb5   :  { %4704 = vst [vmem:[#allocation27_spill] sm:$0xff] %v3714_v58 }
  0xb6   :  { %2603 = vmatpush3.bf16.msra.mxu1 %v3386_v39  ;;  %4700 = vst [vmem:[#allocation11_spill] sm:$0xff] %v3697_v49 }
  0xb7   :  { %2563 = vmatpush3.bf16.msra.mxu0 %v4694_v48  ;;  %2637 = vmatprep.subr.bf16.mxu1 %v3057_v0  ;;  %v4553_v0 = vand.u32 4294901760, %v3635_v44  ;;  %v4550_v48 = vand.u32 4294901760, %v3681_v25 }
  0xb8   :  { %2565 = vmatprep.subr.bf16.mxu0 %v4695_v20  ;;  %v3722_v20 = vpack.c.bf16 %v4543_v35, %v4544_v34  ;;  %v3753_v35 = vld [vmem:[#allocation2 + $0x1b0] sm:$0xff]  ;;  %v4557_v34 = vand.u32 4294901760, %v3714_v58 }
  0xb9   :  { %749 = vmatmul.mubr.f32.vlgmr.msra.gmra.mrb[4].mxu1 %v4696_v56  ;;  %v3732_v56 = vsub.f32 %v3647_v42, %v4547_v18  ;;  %v4560_v43 = vand.u32 4294901760, %v3753_v35 }
  0xba   :  { %756 = vmatprep.mubr.f32.mxu1 %v246_v32  ;;  %2639 = vmatpush3.bf16.msra.mxu1 %v3078_v10  ;;  %v4546_v32 = vand.u32 4294901760, %v3665_v13  ;;  %v4545_v10 = vand.u32 4294901760, %v3667_v61  ;;  %4705 = vst [vmem:[#allocation28_spill] sm:$0xff] %v3722_v20  ;;  %v3850_v20 = vld [vmem:[#allocation2 + $0x138] sm:$0xff] }
  0xbb   :  { %2567 = vmatpush3.bf16.msra.mxu0 %v4698_v6  ;;  %2641 = vmatprep.subr.bf16.mxu1 %v3106_v16  ;;  %v3702_v16 = vsub.f32 %v3635_v44, %v4553_v0  ;;  %4706 = vst [vmem:[#allocation29_spill] sm:$0xff] %v3732_v56  ;;  %v3734_v6 = vld [vmem:[#allocation2 + $0x120] sm:$0xff]  ;;  %v4559_v18 = vand.u32 4294901760, %v3732_v56  ;;  %v3797_v0 = vld [vmem:[#allocation2 + $0x130] sm:$0xff] }
  0xbc   :  { %2569 = vmatprep.subr.bf16.mxu0 %v4699_v37  ;;  %v4707_v37 = vpack.c.bf16 %v3358_v41, %v3356_v57  ;;  %v3749_v12 = vsub.f32 %v3667_v61, %v4545_v10  ;;  %v4556_v41 = vand.u32 4294901760, %v3707_v52  ;;  %v3765_v10 = vsub.f32 %v3679_v22, %v4551_v8 }
  0xbd   :  { %4701 = vst [vmem:[#allocation12_spill] sm:$0xff] %v3702_v16  ;;  %760 = vmatmul.mubr.f32.gmra.mrb[6].mxu1 %v4703_v59  ;;  %v3744_v59 = vsub.f32 %v3665_v13, %v4546_v32  ;;  %v4558_v57 = vand.u32 4294901760, %v3702_v16  ;;  %v3770_v32 = vsub.f32 %v3681_v25, %v4550_v48 }
  0xbe   :  { %2643 = vmatpush3.bf16.msra.mxu1 %v3157_v17  ;;  %2004 = vmatprep.mubr.msk.f32.mxu1 %vm46_vm2, %v4675_v1  ;;  %v4552_v17 = vand.u32 4294901760, %v3676_v29  ;;  %4709 = vst [vmem:[#allocation31_spill] sm:$0xff] %v3749_v12  ;;  %4710 = vst [vmem:[#allocation32_spill] sm:$0xff] %v3765_v10 }
  0xbf   :  { %2571 = vmatpush3.bf16.msra.mxu0 %v4707_v37  ;;  %2645 = vmatprep.subr.bf16.mxu1 %v3174_v26  ;;  %4708 = vst [vmem:[#allocation30_spill] sm:$0xff] %v3744_v59  ;;  %v4555_v26 = vand.u32 4294901760, %v3697_v49  ;;  %v3759_v37 = vld [vmem:[#allocation2 + $0x1b8] sm:$0xff]  ;;  %4711 = vst [vmem:[#allocation33_spill] sm:$0xff] %v3770_v32  ;;  %v4564_v8 = vand.u32 4294901760, %v3744_v59  ;;  %v4568_v30 = vand.u32 4294901760, %v3770_v32 }
  0xc0   :  { %2605 = vmatprep.subr.bf16.mxu0 %v3428_v28  ;;  %v4562_v28 = vand.u32 4294901760, %v3734_v6  ;;  %v1294_v48 = vsub.f32 %v3676_v29, %v4552_v17  ;;  %v1189_v17 = vsub.f32 %v3707_v52, %v4556_v41  ;;  %v1315_v41 = vsub.f32 %v3732_v56, %v4559_v18  ;;  %v4758_v52 = vld [vmem:[#allocation21_spill] sm:$0xff] }
  0xc2   :  { %632 = vmatmul.mubr.f32.vlgmr.msra.gmra.mrb[4].mxu0 %v3539_v60  ;;  %2647 = vmatpush3.bf16.msra.mxu1 %v3205_v36  ;;  %v4565_v60 = vand.u32 4294901760, %v3749_v12  ;;  %v4566_v36 = vand.u32 4294901760, %v3759_v37  ;;  %v1190_v15 = vand.u32 4294901760, %v1189_v17 }
  0xc3   :  { %638 = vmatprep.mubr.f32.mxu0 %v3566_v19  ;;  %2607 = vmatpush3.bf16.msra.mxu0 %v3434_v14  ;;  %v1301_v19 = vsub.f32 %v3697_v49, %v4555_v26  ;;  %v1182_v14 = vsub.f32 %v3702_v16, %v4558_v57  ;;  %v3807_v26 = vsub.f32 %v3734_v6, %v4562_v28 }
  0xc4   :  { %2649 = vmatprep.subr.bf16.mxu1 %v4678_v51  ;;  %2609 = vmatprep.subr.bf16.mxu0 %v3440_v23  ;;  %v1308_v51 = vsub.f32 %v3714_v58, %v4557_v34  ;;  %v4567_v23 = vand.u32 4294901760, %v3765_v10  ;;  %v3817_v34 = vsub.f32 %v3751_v11, %v4561_v54  ;;  %v3822_v57 = vsub.f32 %v3753_v35, %v4560_v43 }
  0xc5   :  { %4712 = vst [vmem:[#allocation34_spill] sm:$0xff] %v3807_v26  ;;  %v3838_v18 = vsub.f32 %v3759_v37, %v4566_v36  ;;  %v1295_v43 = vand.u32 4294901760, %v1294_v48  ;;  %v1302_v54 = vand.u32 4294901760, %v1301_v19  ;;  %v1183_v28 = vand.u32 4294901760, %v1182_v14  ;;  %v4716_v19 = vld [vmem:[#allocation13_spill] sm:$0xff]  ;;  %v4719_v48 = vld [vmem:[#allocation24_spill] sm:$0xff] }
  0xc6   :  { %641 = vmatmul.mubr.f32.gmra.mrb[6].mxu0 %v3568_v46  ;;  %2651 = vmatpush3.bf16.msra.mxu1 %v4680_v53  ;;  %4713 = vst [vmem:[#allocation35_spill] sm:$0xff] %v3817_v34  ;;  %4714 = vst [vmem:[#allocation36_spill] sm:$0xff] %v3822_v57  ;;  %v1196_v46 = vsub.f32 %v3744_v59, %v4564_v8  ;;  %v1203_v53 = vsub.f32 %v3749_v12, %v4565_v60  ;;  %v3867_v17 = vadd.s32 384, %v4719_v48  ;;  %v3879_v12 = vld [vmem:[#allocation2 + $0x148] sm:$0xff] }
  0xc7   :  { %2611 = vmatpush3.bf16.msra.mxu0 %v3446_v27  ;;  %2000 = vmatprep.mubr.msk.f32.mxu0 %vm46_vm2, %v4675_v1  ;;  %4715 = vst [vmem:[#allocation37_spill] sm:$0xff] %v3838_v18  ;;  %v4571_v27 = vand.u32 4294901760, %v3797_v0  ;;  %v1322_v8 = vsub.f32 %v3765_v10, %v4567_v23  ;;  %v1329_v60 = vsub.f32 %v3770_v32, %v4568_v30  ;;  %v4720_v30 = vand.u32 4294901760, %v3807_v26  ;;  %v3877_v10 = vld [vmem:[#allocation2 + $0x140] sm:$0xff] }
  0xc8   :  { %2653 = vmatprep.subr.bf16.mxu1 %v4682_v47  ;;  %2613 = vmatprep.subr.bf16.mxu0 %v3452_v38  ;;  %v1309_v47 = vand.u32 4294901760, %v1308_v51  ;;  %v1316_v38 = vand.u32 4294901760, %v1315_v41  ;;  %v1197_v14 = vand.u32 4294901760, %v1196_v46  ;;  %v1204_v23 = vand.u32 4294901760, %v1203_v53  ;;  %v4718_v41 = vld [vmem:[#allocation14_spill] sm:$0xff] }
  0xc9   :  { %v3861_v36 = vsub.f32 %v3797_v0, %v4571_v27  ;;  %v2700_v51 = vpack.c.bf16 %v1302_v54, %v1295_v43  ;;  %v1323_v46 = vand.u32 4294901760, %v1322_v8  ;;  %v1330_v53 = vand.u32 4294901760, %v1329_v60  ;;  %v3875_v27 = vld [vmem:[#allocation2 + $0x1c8] sm:$0xff]  ;;  %v3891_v60 = vld [vmem:[#allocation2 + $0x1d0] sm:$0xff] }
  0xca   :  { %2655 = vmatpush3.bf16.msra.mxu1 %v4684_v24  ;;  %v3863_v24 = vld [vmem:[#allocation2 + $0x1c0] sm:$0xff]  ;;  %v1210_v32 = vsub.f32 %v3807_v26, %v4720_v30  ;;  %v3882_v43 = vpack.c.bf16 %v1316_v38, %v1309_v47  ;;  %v4721_v54 = vand.u32 4294901760, %v3817_v34  ;;  %v4722_v8 = vand.u32 4294901760, %v3822_v57 }
  0xcb   :  { %2615 = vmatpush3.bf16.msra.mxu0 %v4716_v19  ;;  %2657 = vmatprep.subr.bf16.mxu1 %v4686_v31  ;;  %4717 = vst [vmem:[#allocation13_spill] sm:$0xff] %v3861_v36  ;;  %v3870_v31 = vpack.c.bf16 %v1190_v15, %v1183_v28  ;;  %v3895_v19 = vpack.c.bf16 %v1204_v23, %v1197_v14  ;;  %v4725_v47 = vand.u32 4294901760, %v3633_v62  ;;  %v4582_v14 = vand.u32 4294901760, %v3879_v12 }
  0xcc   :  { %2617 = vmatprep.subr.bf16.mxu0 %v4718_v41  ;;  %v1217_v15 = vsub.f32 %v3817_v34, %v4721_v54  ;;  %v1336_v28 = vsub.f32 %v3822_v57, %v4722_v8  ;;  %v4723_v41 = vld [vmem:[#allocation15_spill] sm:$0xff]  ;;  %v4726_v54 = vand.u32 4294901760, %v3838_v18  ;;  %v3907_v57 = vld [vmem:[#allocation2 + $0x1d8] sm:$0xff]  ;;  %v4727_v34 = vld [vmem:[#allocation16_spill] sm:$0xff]  ;;  %vm48_vm6 = vcmp.eq.s32.totalorder %v3867_v17, %v3521_v33 }
  0xce   :  { %2659 = vmatpush3.bf16.msra.mxu1 %v3364_v40  ;;  %v4724_v40 = vand.u32 4294901760, %v3626_v7  ;;  %v1343_v8 = vsub.f32 %v3838_v18, %v4726_v54  ;;  %v4731_v54 = vand.u32 4294901760, %v3637_v45  ;;  %v1337_v18 = vand.u32 4294901760, %v1336_v28  ;;  %v4734_v45 = vld [vmem:[#allocation17_spill] sm:$0xff] }
  0xcf   :  { %2619 = vmatpush3.bf16.msra.mxu0 %v4723_v41  ;;  %2661 = vmatprep.subr.bf16.mxu1 %v3377_v2  ;;  %v4728_v2 = vand.u32 4294901760, %v3850_v20  ;;  %v3918_v41 = vpack.c.bf16 %v1330_v53, %v1323_v46  ;;  %v4732_v7 = vand.u32 4294901760, %v3863_v24  ;;  %v4735_v53 = vand.u32 4294901760, %v3641_v55 }
  0xd0   :  { %v3901_v38 = vpack.c.bf16 %v4725_v47, %v4724_v40  ;;  %2621 = vmatprep.subr.bf16.mxu0 %v4727_v34  ;;  %v1211_v40 = vand.u32 4294901760, %v1210_v32  ;;  %v4730_v47 = vand.u32 4294901760, %v3635_v44  ;;  %v4587_v34 = vand.u32 4294901760, %v3891_v60  ;;  %v3934_v32 = vld [vmem:[#allocation2 + $0x150] sm:$0xff]  ;;  %v3936_v44 = vld [vmem:[#allocation2 + $0x158] sm:$0xff] }
  0xd1   :  { %v3913_v23 = vsub.f32 %v3850_v20, %v4728_v2  ;;  %v1218_v2 = vand.u32 4294901760, %v1217_v15  ;;  %v3931_v62 = vsub.f32 %v3863_v24, %v4732_v7  ;;  %v4736_v15 = vand.u32 4294901760, %v3647_v42 }
  0xd2   :  { %v3924_v30 = vpack.c.bf16 %v4731_v54, %v4730_v47  ;;  %2663 = vmatpush3.bf16.msra.mxu1 %v3381_v63  ;;  %v1344_v63 = vand.u32 4294901760, %v1343_v8  ;;  %v4737_v7 = vand.u32 4294901760, %v3861_v36  ;;  %v4738_v54 = vld [vmem:[#allocation18_spill] sm:$0xff]  ;;  %v4741_v55 = vand.u32 4294901760, %v3877_v10 }
  0xd3   :  { %4729 = vst [vmem:[#allocation14_spill] sm:$0xff] %v3913_v23  ;;  %4733 = vst [vmem:[#allocation24_spill] sm:$0xff] %v3931_v62  ;;  %2623 = vmatpush3.bf16.msra.mxu0 %v4734_v45  ;;  %2665 = vmatprep.subr.bf16.mxu1 %v3383_v5  ;;  %v3946_v28 = vpack.c.bf16 %v4736_v15, %v4735_v53  ;;  %v4739_v5 = vand.u32 4294901760, %v3875_v27  ;;  %v3968_v8 = vsub.f32 %v3879_v12, %v4582_v14  ;;  %v3970_v53 = vld [vmem:[#allocation2 + $0x1e0] sm:$0xff]  ;;  %v3972_v15 = vld [vmem:[#allocation2 + $0x1e8] sm:$0xff] }
  0xd4   :  { %v3951_v47 = vsub.f32 %v3861_v36, %v4737_v7  ;;  %2625 = vmatprep.subr.bf16.mxu0 %v4738_v54  ;;  %v3963_v42 = vsub.f32 %v3877_v10, %v4741_v55  ;;  %v4744_v7 = vand.u32 4294901760, %v3665_v13  ;;  %v4745_v54 = vand.u32 4294901760, %v3667_v61  ;;  %v4751_v61 = vld [vmem:[#allocation20_spill] sm:$0xff]  ;;  %v4756_v45 = vld [vmem:[#allocation25_spill] sm:$0xff] }
  0xd5   :  { %v3958_v46 = vsub.f32 %v3875_v27, %v4739_v5  ;;  %4743 = vst [vmem:[#allocation17_spill] sm:$0xff] %v3968_v8  ;;  %v3983_v55 = vsub.f32 %v3891_v60, %v4587_v34  ;;  %v4747_v36 = vmov 0.0   ;;  %v3992_v26 = vpack.c.bf16 %v1218_v2, %v1211_v40  ;;  %v4750_v34 = vld [vmem:[#allocation19_spill] sm:$0xff]  ;;  %v4006_v40 = vld [vmem:[#allocation2 + $0x160] sm:$0xff] }
  0xd6   :  { %4742 = vst [vmem:[#allocation16_spill] sm:$0xff] %v3963_v42  ;;  %v3978_v5 = vpack.c.bf16 %v4745_v54, %v4744_v7  ;;  %2667 = vmatpush3.bf16.msra.mxu1 %v3386_v39  ;;  %v1991_v13 = vsel %vm48_vm6, 1.0, %v4747_v36  ;;  %v4748_v7 = vand.u32 4294901760, %v3907_v57  ;;  %v4001_v14 = vpack.c.bf16 %v1344_v63, %v1337_v18  ;;  %v4008_v2 = vld [vmem:[#allocation2 + $0x168] sm:$0xff]  ;;  %v4017_v63 = vld [vmem:[#allocation2 + $0x1f0] sm:$0xff] }
  0xd7   :  { %4740 = vst [vmem:[#allocation15_spill] sm:$0xff] %v3958_v46  ;;  %4746 = vst [vmem:[#allocation18_spill] sm:$0xff] %v3983_v55  ;;  %2627 = vmatpush3.bf16.msra.mxu0 %v4750_v34  ;;  %2701 = vmatprep.subr.bf16.mxu1 %v2700_v51  ;;  %v1225_v39 = vand.u32 4294901760, %v3951_v47  ;;  %v4019_v47 = vld [vmem:[#allocation2 + $0x1f8] sm:$0xff]  ;;  %v4755_v34 = vand.u32 4294901760, %v3936_v44  ;;  %v4766_v29 = vand.u32 4294901760, %v3968_v8  ;;  %vm52_vm8 = vcmp.eq.s32.totalorder %v3867_v17, %v4756_v45 }
  0xd8   :  { %v3998_v54 = vsub.f32 %v3907_v57, %v4748_v7  ;;  %2629 = vmatprep.subr.bf16.mxu0 %v4751_v61  ;;  %v4752_v7 = vand.u32 4294901760, %v3913_v23  ;;  %4753 = vst [vmem:[#allocation19_spill] sm:$0xff] %v4017_v63  ;;  %v4025_v61 = vsub.f32 %v1991_v13, %v1991_v13  ;;  %v4757_v13 = vand.u32 4294901760, %v3931_v62 }
  0xd9   :  { %2005 = vmatmul.mubr.msk.f32.vlgmr.msra.gmra.mrb[8].mxu1 %vm45_vm3, %v4675_v1  ;;  %v4036_v18 = vsub.f32 %v3936_v44, %v4755_v34  ;;  %v4759_v34 = vand.u32 4294901760, %v3970_v53 }
  0xda   :  { %4749 = vst [vmem:[#allocation38_spill] sm:$0xff] %v3998_v54  ;;  %v1231_v56 = vsub.f32 %v3913_v23, %v4752_v7  ;;  %v4754_v7 = vand.u32 4294901760, %v3934_v32  ;;  %2006 = vmatprep.mubr.msk.f32.mxu1 %vm50_vm4, %v4675_v1  ;;  %2703 = vmatpush3.bf16.msra.mxu1 %v3870_v31  ;;  %v1350_v59 = vsub.f32 %v3931_v62, %v4757_v13  ;;  %v4761_v31 = vand.u32 4294901760, %v3972_v15  ;;  %v4763_v23 = vld [vmem:[#allocation22_spill] sm:$0xff] }
  0xdb   :  { %2631 = vmatpush3.bf16.msra.mxu0 %v4758_v52  ;;  %2705 = vmatprep.subr.bf16.mxu1 %v3882_v43  ;;  %v4054_v16 = vsub.f32 %v3970_v53, %v4759_v34  ;;  %v4764_v52 = vand.u32 4294901760, %v3958_v46  ;;  %v4765_v62 = vand.u32 4294901760, %v3963_v42 }
  0xdc   :  { %v4031_v51 = vsub.f32 %v3934_v32, %v4754_v7  ;;  %v4059_v49 = vsub.f32 %v3972_v15, %v4761_v31  ;;  %2633 = vmatprep.subr.bf16.mxu0 %v4763_v23  ;;  %v1232_v58 = vand.u32 4294901760, %v1231_v56  ;;  %v1245_v31 = vsub.f32 %v3968_v8, %v4766_v29 }
  0xdd   :  { %4760 = vst [vmem:[#allocation20_spill] sm:$0xff] %v4054_v16  ;;  %v1357_v43 = vsub.f32 %v3958_v46, %v4764_v52  ;;  %v1238_v34 = vsub.f32 %v3963_v42, %v4765_v62  ;;  %2007 = vmatmul.mubr.msk.f32.gmra.mrb[10].mxu1 %vm49_vm5, %v4675_v1  ;;  %v4767_v56 = vand.u32 4294901760, %v3983_v55  ;;  %v4768_v29 = vand.u32 4294901760, %v3998_v54 }
  0xde   :  { %4762 = vst [vmem:[#allocation25_spill] sm:$0xff] %v4059_v49  ;;  %2707 = vmatpush3.bf16.msra.mxu1 %v3895_v19  ;;  %2008 = vmatprep.mubr.msk.f32.mxu1 %vm48_vm6, %v4675_v1  ;;  %v4769_v23 = vand.u32 4294901760, %v4006_v40  ;;  %v4771_v19 = vld [vmem:[#allocation23_spill] sm:$0xff]  ;;  %v4774_v52 = vand.u32 4294901760, %v4025_v61  ;;  %v1246_v4 = vand.u32 4294901760, %v1245_v31  ;;  %v4775_v3 = vand.u32 4294901760, %v4031_v51 }
  0xdf   :  { %v1364_v7 = vsub.f32 %v3983_v55, %v4767_v56  ;;  %v1371_v62 = vsub.f32 %v3998_v54, %v4768_v29  ;;  %v4770_v56 = vand.u32 4294901760, %v4008_v2  ;;  %2635 = vmatpush3.bf16.msra.mxu0 %v4771_v19  ;;  %2709 = vmatprep.subr.bf16.mxu1 %v3918_v41  ;;  %v4772_v29 = vand.u32 4294901760, %v4017_v63 }
  0xe0   :  { %v4094_v8 = vsub.f32 %v4006_v40, %v4769_v23  ;;  %v4773_v23 = vand.u32 4294901760, %v4019_v47  ;;  %2669 = vmatprep.subr.bf16.mxu0 %v3901_v38  ;;  %v1351_v19 = vand.u32 4294901760, %v1350_v59  ;;  %v1358_v46 = vand.u32 4294901760, %v1357_v43 }
  0xe1   :  { %v4099_v13 = vsub.f32 %v4008_v2, %v4770_v56  ;;  %v4108_v54 = vsub.f32 %v4017_v63, %v4772_v29  ;;  %v2714_v56 = vpack.c.bf16 %v1232_v58, %v1225_v39  ;;  %v1239_v41 = vand.u32 4294901760, %v1238_v34 }
  0xe2   :  { %v4113_v42 = vsub.f32 %v4019_v47, %v4773_v23  ;;  %v1150_v55 = vsub.f32 %v4025_v61, %v4774_v52  ;;  %v1252_v29 = vsub.f32 %v4031_v51, %v4775_v3  ;;  %v4776_v63 = vand.u32 4294901760, %v4036_v18  ;;  %2001 = vmatmul.mubr.msk.f32.vlgmr.msra.gmra.mrb[8].mxu0 %vm45_vm3, %v4675_v1  ;;  %2711 = vmatpush3.bf16.msra.mxu1 %v3992_v26 }
  0xe3   :  { %v1365_v58 = vand.u32 4294901760, %v1364_v7  ;;  %v1372_v59 = vand.u32 4294901760, %v1371_v62  ;;  %2002 = vmatprep.mubr.msk.f32.mxu0 %vm50_vm4, %v4675_v1  ;;  %2671 = vmatpush3.bf16.msra.mxu0 %v3924_v30  ;;  %v4777_v3 = vand.u32 4294901760, %v4054_v16  ;;  %v4778_v34 = vand.u32 4294901760, %v4059_v49 }
  0xe4   :  { %v1259_v23 = vsub.f32 %v4036_v18, %v4776_v63  ;;  %2713 = vmatprep.subr.bf16.mxu1 %v4001_v14  ;;  %2673 = vmatprep.subr.bf16.mxu0 %v3946_v28  ;;  %v2716_v21 = vpack.c.bf16 %v1358_v46, %v1351_v19  ;;  %v4779_v52 = vand.u32 4294901760, %v3679_v22  ;;  %v4780_v62 = vand.u32 4294901760, %v3681_v25 }
  0xe5   :  { %v1378_v63 = vsub.f32 %v4054_v16, %v4777_v3  ;;  %v1385_v26 = vsub.f32 %v4059_v49, %v4778_v34  ;;  %v4781_v3 = vand.u32 4294901760, %v3734_v6  ;;  %v4782_v39 = vand.u32 4294901760, %v3751_v11 }
  0xe6   :  { %v4151_v43 = vpack.c.bf16 %v4780_v62, %v4779_v52  ;;  %v1151_v7 = vand.u32 4294901760, %v1150_v55  ;;  %v2718_v49 = vpack.c.bf16 %v1246_v4, %v1239_v41  ;;  %v1253_v31 = vand.u32 4294901760, %v1252_v29  ;;  %2003 = vmatmul.mubr.msk.f32.gmra.mrb[10].mxu0 %vm49_vm5, %v4675_v1  ;;  %2715 = vmatpush3.bf16.msra.mxu1 %v2714_v56 }
  0xe7   :  { %v4157_v34 = vpack.c.bf16 %v4782_v39, %v4781_v3  ;;  %v1260_v16 = vand.u32 4294901760, %v1259_v23  ;;  %v2720_v22 = vpack.c.bf16 %v1372_v59, %v1365_v58  ;;  %v4783_v25 = vand.u32 4294901760, %v4094_v8  ;;  %2675 = vmatpush3.bf16.msra.mxu0 %v3978_v5  ;;  %2717 = vmatprep.subr.bf16.mxu1 %v2716_v21 }
  0xe8   :  { %v4784_v6 = vand.u32 4294901760, %v4099_v13  ;;  %1152 = vmatprep.mubr.f32.mxu0 %v1151_v7  ;;  %v1379_v4 = vand.u32 4294901760, %v1378_v63  ;;  %v1386_v46 = vand.u32 4294901760, %v1385_v26  ;;  %v4785_v55 = vand.u32 4294901760, %v4108_v54  ;;  %2677 = vmatprep.subr.bf16.mxu0 %v4151_v43 }
  0xe9   :  { %v1266_v14 = vsub.f32 %v4094_v8, %v4783_v25  ;;  %v4786_v56 = vand.u32 4294901760, %v4113_v42  ;;  %v4787_v29 = vand.u32 4294901760, %v3753_v35  ;;  %v4788_v23 = vand.u32 4294901760, %v3759_v37 }
  0xea   :  { %v1273_v11 = vsub.f32 %v4099_v13, %v4784_v6  ;;  %v1392_v19 = vsub.f32 %v4108_v54, %v4785_v55  ;;  %v4184_v59 = vadd.s32 256, %v4719_v48  ;;  %v2722_v39 = vpack.c.bf16 %v1260_v16, %v1253_v31  ;;  %2719 = vmatpush3.bf16.msra.mxu1 %v2718_v49 }
  0xeb   :  { %v1399_v41 = vsub.f32 %v4113_v42, %v4786_v56  ;;  %v4181_v58 = vpack.c.bf16 %v4788_v23, %v4787_v29  ;;  %v1267_v63 = vand.u32 4294901760, %v1266_v14  ;;  %v4789_v7 = vand.u32 4294901760, %v3652_v9  ;;  %2679 = vmatpush3.bf16.msra.mxu0 %v4157_v34  ;;  %2721 = vmatprep.subr.bf16.mxu1 %v2720_v22 }
  0xec   :  { %v1274_v26 = vand.u32 4294901760, %v1273_v11  ;;  %v4790_v21 = vand.u32 4294901760, %v3657_v50  ;;  %v4791_v35 = vand.u32 4294901760, %v3797_v0  ;;  %v4792_v37 = vand.u32 4294901760, %v3850_v20 }
  0xed   :  { %v1280_v52 = vsub.f32 %v3652_v9, %v4789_v7  ;;  %v2724_v49 = vpack.c.bf16 %v1386_v46, %v1379_v4  ;;  %v1393_v16 = vand.u32 4294901760, %v1392_v19  ;;  %v1400_v31 = vand.u32 4294901760, %v1399_v41  ;;  %2681 = vmatprep.subr.bf16.mxu0 %v4181_v58  ;;  %v4805_v7 = vld [vmem:[#allocation19_spill] sm:$0xff] }
  0xee   :  { %v1287_v62 = vsub.f32 %v3657_v50, %v4790_v21  ;;  %v4197_v48 = vpack.c.bf16 %v4792_v37, %v4791_v35  ;;  %v4793_v3 = vand.u32 4294901760, %v3863_v24  ;;  %v4794_v25 = vand.u32 4294901760, %v3875_v27  ;;  %2723 = vmatpush3.bf16.msra.mxu1 %v2722_v39  ;;  %v4810_v35 = vld [vmem:[#allocation9_spill] sm:$0xff] }
  0xef   :  { %vm47_vm7 = vcmp.eq.s32.totalorder %v4184_v59, %v3521_v33  ;;  %v2726_v0 = vpack.c.bf16 %v1274_v26, %v1267_v63  ;;  %v1281_v22 = vand.u32 4294901760, %v1280_v52  ;;  %2725 = vmatprep.subr.bf16.mxu1 %v2724_v49  ;;  %v4795_v6 = vand.u32 4294901760, %v3877_v10 }
  0xf0   :  { %v4204_v14 = vpack.c.bf16 %v4794_v25, %v4793_v3  ;;  %v1288_v20 = vand.u32 4294901760, %v1287_v62  ;;  %2683 = vmatpush3.bf16.msra.mxu0 %v4197_v48  ;;  %v4796_v11 = vand.u32 4294901760, %v3879_v12  ;;  %v2728_v24 = vpack.c.bf16 %v1400_v31, %v1393_v16  ;;  %v4812_v31 = vld [vmem:[#allocation10_spill] sm:$0xff]  ;;  %v4813_v3 = vld [vmem:[#allocation11_spill] sm:$0xff] }
  0xf1   :  { %v4797_v27 = vand.u32 4294901760, %v3891_v60  ;;  %v4798_v46 = vand.u32 4294901760, %v3907_v57  ;;  %v1990_v10 = vsel %vm47_vm7, 1.0, %v4747_v36  ;;  %v1995_v19 = vsel %vm52_vm8, 1.0, %v4747_v36 }
  0xf2   :  { %v4213_v4 = vpack.c.bf16 %v4796_v11, %v4795_v6  ;;  %2685 = vmatprep.subr.bf16.mxu0 %v4204_v14  ;;  %2727 = vmatpush3.bf16.msra.mxu1 %v2726_v0  ;;  %v2730_v12 = vpack.c.bf16 %v1288_v20, %v1281_v22  ;;  %vm51_vm9 = vcmp.eq.s32.totalorder %v4184_v59, %v4756_v45  ;;  %v4799_v57 = vand.u32 4294901760, %v3934_v32  ;;  %v4815_v6 = vld [vmem:[#allocation12_spill] sm:$0xff]  ;;  %v4816_v11 = vld [vmem:[#allocation26_spill] sm:$0xff] }
  0xf3   :  { %v4222_v55 = vpack.c.bf16 %v4798_v46, %v4797_v27  ;;  %2729 = vmatprep.subr.bf16.mxu1 %v2728_v24  ;;  %v4800_v60 = vand.u32 4294901760, %v3936_v44  ;;  %v4241_v41 = vsub.f32 %v1990_v10, %v1990_v10  ;;  %v4801_v29 = vand.u32 4294901760, %v3970_v53  ;;  %v4817_v10 = vld [vmem:[#allocation27_spill] sm:$0xff] }
  0xf4   :  { %2687 = vmatpush3.bf16.msra.mxu0 %v4213_v4  ;;  %v4802_v23 = vand.u32 4294901760, %v3972_v15  ;;  %v4250_v63 = vsub.f32 %v1995_v19, %v1995_v19  ;;  %v1994_v32 = vsel %vm51_vm9, 1.0, %v4747_v36  ;;  %v4803_v44 = vand.u32 4294901760, %v4006_v40 }
  0xf5   :  { %v4239_v56 = vpack.c.bf16 %v4800_v60, %v4799_v57  ;;  %2689 = vmatprep.subr.bf16.mxu0 %v4222_v55  ;;  %v4804_v53 = vand.u32 4294901760, %v4008_v2  ;;  %v4265_v15 = vsub.f32 %v1994_v32, %v1994_v32  ;;  %v4806_v52 = vand.u32 4294901760, %v4805_v7  ;;  %v4808_v2 = vld [vmem:[#allocation8_spill] sm:$0xff]  ;;  %v4819_v60 = vld [vmem:[#allocation30_spill] sm:$0xff] }
  0xf6   :  { %v4248_v39 = vpack.c.bf16 %v4802_v23, %v4801_v29  ;;  %2731 = vmatpush3.bf16.msra.mxu1 %v2730_v12  ;;  %v4807_v21 = vand.u32 4294901760, %v4019_v47  ;;  %v1155_v62 = vand.u32 4294901760, %v4241_v41  ;;  %v1164_v40 = vand.u32 4294901760, %v4250_v63  ;;  %v4818_v12 = vld [vmem:[#allocation29_spill] sm:$0xff]  ;;  %v4820_v29 = vld [vmem:[#allocation31_spill] sm:$0xff] }
  0xf7   :  { %2765 = vmatprep.subr.bf16.mxu1 %v3901_v38  ;;  %v4262_v26 = vpack.c.bf16 %v4804_v53, %v4803_v44  ;;  %v4809_v47 = vand.u32 4294901760, %v4808_v2  ;;  %v4811_v37 = vand.u32 4294901760, %v4810_v35  ;;  %v2732_v25 = vpack.c.bf16 %v4813_v3, %v4812_v31  ;;  %v4821_v44 = vld [vmem:[#allocation32_spill] sm:$0xff]  ;;  %v4822_v53 = vld [vmem:[#allocation33_spill] sm:$0xff] }
  0xf8   :  { %2691 = vmatpush3.bf16.msra.mxu0 %v4239_v56  ;;  %v4271_v36 = vpack.c.bf16 %v4807_v21, %v4806_v52  ;;  %v1156_v16 = vsub.f32 %v4241_v41, %v1155_v62  ;;  %v1170_v0 = vand.u32 4294901760, %v4265_v15  ;;  %v1165_v22 = vsub.f32 %v4250_v63, %v1164_v40  ;;  %v4823_v52 = vld [vmem:[#allocation34_spill] sm:$0xff]  ;;  %v4824_v21 = vld [vmem:[#allocation35_spill] sm:$0xff]  ;;  %v4826_v35 = vld [vmem:[#allocation37_spill] sm:$0xff] }
  0xf9   :  { %2693 = vmatprep.subr.bf16.mxu0 %v4248_v39  ;;  %2009 = vmatmul.mubr.msk.f32.vlgmr.msra.gmra.mrb[12].mxu1 %vm47_vm7, %v4675_v1  ;;  %v4290_v49 = vpack.c.bf16 %v4811_v37, %v4809_v47  ;;  %v4814_v20 = vand.u32 4294901760, %v4025_v61  ;;  %v2734_v24 = vpack.c.bf16 %v4816_v11, %v4815_v6  ;;  %v2736_v19 = vpack.c.bf16 %v4818_v12, %v4817_v10  ;;  %v4825_v47 = vld [vmem:[#allocation36_spill] sm:$0xff] }
  0xfa   :  { %2010 = vmatprep.mubr.msk.f32.mxu1 %vm52_vm8, %v4675_v1  ;;  %2767 = vmatpush3.bf16.msra.mxu1 %v3924_v30  ;;  %v1157_v27 = vand.u32 4294901760, %v1156_v16  ;;  %v1171_v46 = vsub.f32 %v4265_v15, %v1170_v0  ;;  %v1166_v57 = vand.u32 4294901760, %v1165_v22  ;;  %v2738_v23 = vpack.c.bf16 %v4820_v29, %v4819_v60  ;;  %v4827_v16 = vld [vmem:[#allocation13_spill] sm:$0xff] }
  0xfb   :  { %2769 = vmatprep.subr.bf16.mxu1 %v3946_v28  ;;  %v2740_v7 = vpack.c.bf16 %v4822_v53, %v4821_v44  ;;  %v2742_v2 = vpack.c.bf16 %v4824_v21, %v4823_v52  ;;  %v2744_v37 = vpack.c.bf16 %v4826_v35, %v4825_v47 }
  0xfc   :  { %2695 = vmatpush3.bf16.msra.mxu0 %v4262_v26  ;;  %v1172_v32 = vand.u32 4294901760, %v1171_v46  ;;  %v4832_v46 = vld [vmem:[#allocation17_spill] sm:$0xff] }
  0xfd   :  { %2697 = vmatprep.subr.bf16.mxu0 %v4271_v36  ;;  %2011 = vmatmul.mubr.msk.f32.gmra.mrb[14].mxu1 %vm51_vm9, %v4675_v1 }
  0xfe   :  { %2771 = vmatpush3.bf16.msra.mxu1 %v3978_v5  ;;  %1663 = vmatprep.mubr.f32.mxu1 %v4814_v20  ;;  %v4829_v20 = vld [vmem:[#allocation24_spill] sm:$0xff] }
  0xff   :  { %2773 = vmatprep.subr.bf16.mxu1 %v4151_v43 }
 0x100   :  { %2699 = vmatpush3.bf16.msra.mxu0 %v4290_v49 }
 0x101   :  { %2733 = vmatprep.subr.bf16.mxu0 %v2732_v25  ;;  %v4828_v25 = vld [vmem:[#allocation14_spill] sm:$0xff] }
 0x102   :  { %2775 = vmatpush3.bf16.msra.mxu1 %v4157_v34  ;;  %v2746_v22 = vpack.c.bf16 %v4828_v25, %v4827_v16 }
 0x103   :  { %1158 = vmatmul.mubr.f32.vlgmr.msra.gmra.mrb[12].mxu0 %v1157_v27  ;;  %2777 = vmatprep.subr.bf16.mxu1 %v4181_v58  ;;  %v4831_v27 = vld [vmem:[#allocation16_spill] sm:$0xff] }
 0x104   :  { %1167 = vmatprep.mubr.f32.mxu0 %v1166_v57  ;;  %2735 = vmatpush3.bf16.msra.mxu0 %v2734_v24  ;;  %v4833_v57 = vld [vmem:[#allocation18_spill] sm:$0xff] }
 0x105   :  { %2737 = vmatprep.subr.bf16.mxu0 %v2736_v19  ;;  %v2750_v19 = vpack.c.bf16 %v4832_v46, %v4831_v27 }
 0x106   :  { %2779 = vmatpush3.bf16.msra.mxu1 %v4197_v48 }
 0x107   :  { %1173 = vmatmul.mubr.f32.gmra.mrb[14].mxu0 %v1172_v32  ;;  %2781 = vmatprep.subr.bf16.mxu1 %v4204_v14 }
 0x108   :  { %2739 = vmatpush3.bf16.msra.mxu0 %v2738_v23  ;;  %1547 = vmatprep.mubr.f32.mxu0 %v4025_v61  ;;  %v4830_v61 = vld [vmem:[#allocation15_spill] sm:$0xff]  ;;  %v4834_v23 = vld [vmem:[#allocation38_spill] sm:$0xff] }
 0x109   :  { %2741 = vmatprep.subr.bf16.mxu0 %v2740_v7  ;;  %v2748_v24 = vpack.c.bf16 %v4830_v61, %v4829_v20  ;;  %v2752_v32 = vpack.c.bf16 %v4834_v23, %v4833_v57  ;;  %v2754_v7 = vpack.c.bf16 %v4036_v18, %v4031_v51 }
 0x10a   :  { %2783 = vmatpush3.bf16.msra.mxu1 %v4213_v4 }
 0x10b   :  { %2785 = vmatprep.subr.bf16.mxu1 %v4222_v55 }
 0x10c   :  { %2743 = vmatpush3.bf16.msra.mxu0 %v2742_v2  ;;  %v4835_v2 = vld [vmem:[#allocation20_spill] sm:$0xff] }
 0x10d   :  { %2745 = vmatprep.subr.bf16.mxu0 %v2744_v37  ;;  %v4836_v37 = vld [vmem:[#allocation25_spill] sm:$0xff] }
 0x10e   :  { %2787 = vmatpush3.bf16.msra.mxu1 %v4239_v56 }
 0x10f   :  { %2789 = vmatprep.subr.bf16.mxu1 %v4248_v39 }
 0x110   :  { %2747 = vmatpush3.bf16.msra.mxu0 %v2746_v22  ;;  %v2756_v22 = vpack.c.bf16 %v4836_v37, %v4835_v2 }
 0x111   :  { %2749 = vmatprep.subr.bf16.mxu0 %v2748_v24  ;;  %v2758_v24 = vpack.c.bf16 %v4099_v13, %v4094_v8 }
 0x112   :  { %2791 = vmatpush3.bf16.msra.mxu1 %v4262_v26 }
 0x113   :  { %2793 = vmatprep.subr.bf16.mxu1 %v4271_v36 }
 0x114   :  { %2751 = vmatpush3.bf16.msra.mxu0 %v2750_v19  ;;  %v2760_v19 = vpack.c.bf16 %v4113_v42, %v4108_v54 }
 0x115   :  { %2753 = vmatprep.subr.bf16.mxu0 %v2752_v32  ;;  %v4837_v32 = vand.u32 4294901760, %v4812_v31 }
 0x116   :  { %2795 = vmatpush3.bf16.msra.mxu1 %v4290_v49 }
 0x117   :  { %2829 = vmatprep.subr.bf16.mxu1 %v3901_v38  ;;  %v2762_v38 = vpack.c.bf16 %v3657_v50, %v3652_v9  ;;  %v4840_v9 = vand.u32 4294901760, %v4816_v11 }
 0x118   :  { %2755 = vmatpush3.bf16.msra.mxu0 %v2754_v7  ;;  %v4838_v7 = vand.u32 4294901760, %v4813_v3  ;;  %v4845_v3 = vand.u32 4294901760, %v4821_v44 }
 0x119   :  { %2757 = vmatprep.subr.bf16.mxu0 %v2756_v22  ;;  %1667 = vmatmul.mubr.f32.vlgmr.msra.gmra.mrb[16].mxu1 %v1155_v62  ;;  %v4842_v62 = vand.u32 4294901760, %v4818_v12 }
 0x11a   :  { %1674 = vmatprep.mubr.f32.mxu1 %v1164_v40  ;;  %2831 = vmatpush3.bf16.msra.mxu1 %v3924_v30  ;;  %v2796_v22 = vpack.c.bf16 %v4838_v7, %v4837_v32  ;;  %v4839_v30 = vand.u32 4294901760, %v4815_v6 }
 0x11b   :  { %2833 = vmatprep.subr.bf16.mxu1 %v3946_v28  ;;  %v4841_v28 = vand.u32 4294901760, %v4817_v10  ;;  %v4852_v10 = vand.u32 4294901760, %v4828_v25 }
 0x11c   :  { %2759 = vmatpush3.bf16.msra.mxu0 %v2758_v24  ;;  %v2798_v50 = vpack.c.bf16 %v4840_v9, %v4839_v30 }
 0x11d   :  { %2761 = vmatprep.subr.bf16.mxu0 %v2760_v19  ;;  %1678 = vmatmul.mubr.f32.gmra.mrb[18].mxu1 %v1170_v0  ;;  %v2800_v40 = vpack.c.bf16 %v4842_v62, %v4841_v28  ;;  %v4846_v0 = vand.u32 4294901760, %v4822_v53  ;;  %v4857_v53 = vand.u32 4294901760, %v4833_v57 }
 0x11e   :  { %2835 = vmatpush3.bf16.msra.mxu1 %v3978_v5  ;;  %2016 = vmatprep.mubr.msk.f32.mxu1 %vm48_vm6, %v4675_v1  ;;  %v4843_v5 = vand.u32 4294901760, %v4819_v60  ;;  %v4853_v60 = vand.u32 4294901760, %v4829_v20  ;;  %v4863_v20 = vand.u32 4294901760, %v4094_v8  ;;  %v4867_v8 = vld [vmem:[#allocation28_spill] sm:$0xff] }
 0x11f   :  { %2837 = vmatprep.subr.bf16.mxu1 %v4151_v43  ;;  %v4844_v43 = vand.u32 4294901760, %v4820_v29  ;;  %v2804_v6 = vpack.c.bf16 %v4846_v0, %v4845_v3 }
 0x120   :  { %2763 = vmatpush3.bf16.msra.mxu0 %v2762_v38 }
 0x121   :  { %2797 = vmatprep.subr.bf16.mxu0 %v2796_v22  ;;  %v2802_v31 = vpack.c.bf16 %v4844_v43, %v4843_v5 }
 0x122   :  { %2839 = vmatpush3.bf16.msra.mxu1 %v4157_v34  ;;  %v4847_v34 = vand.u32 4294901760, %v4823_v52  ;;  %v4858_v52 = vand.u32 4294901760, %v4834_v23 }
 0x123   :  { %1550 = vmatmul.mubr.f32.vlgmr.msra.gmra.mrb[16].mxu0 %v4241_v41  ;;  %2841 = vmatprep.subr.bf16.mxu1 %v4181_v58  ;;  %v4848_v58 = vand.u32 4294901760, %v4824_v21 }
 0x124   :  { %1556 = vmatprep.mubr.f32.mxu0 %v4250_v63  ;;  %2799 = vmatpush3.bf16.msra.mxu0 %v2798_v50  ;;  %v4849_v63 = vand.u32 4294901760, %v4825_v47  ;;  %v2816_v21 = vpack.c.bf16 %v4858_v52, %v4857_v53 }
 0x125   :  { %2801 = vmatprep.subr.bf16.mxu0 %v2800_v40  ;;  %v2806_v41 = vpack.c.bf16 %v4848_v58, %v4847_v34 }
 0x126   :  { %2843 = vmatpush3.bf16.msra.mxu1 %v4197_v48  ;;  %v4851_v48 = vand.u32 4294901760, %v4827_v16  ;;  %v4862_v16 = vand.u32 4294901760, %v4836_v37 }
 0x127   :  { %1559 = vmatmul.mubr.f32.gmra.mrb[18].mxu0 %v4265_v15  ;;  %2845 = vmatprep.subr.bf16.mxu1 %v4204_v14  ;;  %v4850_v15 = vand.u32 4294901760, %v4826_v35  ;;  %v4854_v14 = vand.u32 4294901760, %v4830_v61  ;;  %v4861_v35 = vand.u32 4294901760, %v4835_v2 }
 0x128   :  { %2803 = vmatpush3.bf16.msra.mxu0 %v2802_v31  ;;  %2012 = vmatprep.mubr.msk.f32.mxu0 %vm48_vm6, %v4675_v1  ;;  %v2810_v12 = vpack.c.bf16 %v4852_v10, %v4851_v48 }
 0x129   :  { %2805 = vmatprep.subr.bf16.mxu0 %v2804_v6  ;;  %v2808_v11 = vpack.c.bf16 %v4850_v15, %v4849_v63  ;;  %v2812_v29 = vpack.c.bf16 %v4854_v14, %v4853_v60  ;;  %v2820_v25 = vpack.c.bf16 %v4862_v16, %v4861_v35 }
 0x12a   :  { %2847 = vmatpush3.bf16.msra.mxu1 %v4213_v4  ;;  %v4855_v4 = vand.u32 4294901760, %v4831_v27 }
 0x12b   :  { %2849 = vmatprep.subr.bf16.mxu1 %v4222_v55  ;;  %v4856_v55 = vand.u32 4294901760, %v4832_v46 }
 0x12c   :  { %2807 = vmatpush3.bf16.msra.mxu0 %v2806_v41 }
 0x12d   :  { %2809 = vmatprep.subr.bf16.mxu0 %v2808_v11  ;;  %v2814_v44 = vpack.c.bf16 %v4856_v55, %v4855_v4 }
 0x12e   :  { %2851 = vmatpush3.bf16.msra.mxu1 %v4239_v56  ;;  %v4859_v56 = vand.u32 4294901760, %v4031_v51  ;;  %v4865_v51 = vand.u32 4294901760, %v4108_v54 }
 0x12f   :  { %2853 = vmatprep.subr.bf16.mxu1 %v4248_v39  ;;  %v4860_v39 = vand.u32 4294901760, %v4036_v18  ;;  %v4866_v18 = vand.u32 4294901760, %v4113_v42 }
 0x130   :  { %2811 = vmatpush3.bf16.msra.mxu0 %v2810_v12 }
 0x131   :  { %2813 = vmatprep.subr.bf16.mxu0 %v2812_v29  ;;  %v2818_v47 = vpack.c.bf16 %v4860_v39, %v4859_v56 }
 0x132   :  { %2855 = vmatpush3.bf16.msra.mxu1 %v4262_v26  ;;  %v4864_v26 = vand.u32 4294901760, %v4099_v13 }
 0x133   :  { %2857 = vmatprep.subr.bf16.mxu1 %v4271_v36  ;;  %v2824_v36 = vpack.c.bf16 %v4866_v18, %v4865_v51 }
 0x134   :  { %2815 = vmatpush3.bf16.msra.mxu0 %v2814_v44  ;;  %v2822_v61 = vpack.c.bf16 %v4864_v26, %v4863_v20 }
 0x135   :  { %2817 = vmatprep.subr.bf16.mxu0 %v2816_v21 }
 0x136   :  { %2859 = vmatpush3.bf16.msra.mxu1 %v4290_v49 }
 0x138   :  { %2819 = vmatpush3.bf16.msra.mxu0 %v2818_v47 }
 0x139   :  { %2821 = vmatprep.subr.bf16.mxu0 %v2820_v25  ;;  %2017 = vmatmul.mubr.msk.f32.vlgmr.msra.gmra.mrb[20].mxu1 %vm47_vm7, %v4675_v1 }
 0x13a   :  { %2018 = vmatprep.mubr.msk.f32.mxu1 %vm52_vm8, %v4675_v1 }
 0x13c   :  { %2823 = vmatpush3.bf16.msra.mxu0 %v2822_v61 }
 0x13d   :  { %2825 = vmatprep.subr.bf16.mxu0 %v2824_v36  ;;  %2019 = vmatmul.mubr.msk.f32.gmra.mrb[22].mxu1 %vm51_vm9, %v4675_v1 }
 0x140   :  { %2827 = vmatpush3.bf16.msra.mxu0 %v4867_v8 }
 0x143   :  { %2013 = vmatmul.mubr.msk.f32.vlgmr.msra.gmra.mrb[20].mxu0 %vm47_vm7, %v4675_v1 }
 0x144   :  { %2014 = vmatprep.mubr.msk.f32.mxu0 %vm52_vm8, %v4675_v1 }
 0x147   :  { %2015 = vmatmul.mubr.msk.f32.gmra.mrb[22].mxu0 %vm51_vm9, %v4675_v1 }
 0x16c   :  { %v2090_v42 = vpop.f32.mrb[0].mxu1 }
 0x16d   :  { %v2091_v54 = vpop.f32.mrb[1].mxu1 }
 0x16e   :  { %v2092_v13 = vadd.f32 %v2091_v54, %v2090_v42 }
 0x170   :  { %v2093_v49 = vpop.f32.mrb[2].mxu1 }
 0x171   :  { %v2094_v27 = vpop.f32.mrb[3].mxu1 }
 0x172   :  { %v2095_v46 = vadd.f32 %v2094_v27, %v2093_v49 }
 0x175   :  { %v2052_v57 = vpop.f32.mrb[0].mxu0 }
 0x176   :  { %v2053_v23 = vpop.f32.mrb[1].mxu0 }
 0x177   :  { %v2054_v33 = vadd.f32 %v2053_v23, %v2052_v57 }
 0x179   :  { %v489_v2 = vadd.f32 %v2092_v13, %v2054_v33  ;;  %v2055_v37 = vpop.f32.mrb[2].mxu0 }
 0x17a   :  { %v2056_v24 = vpop.f32.mrb[3].mxu0 }
 0x17b   :  { %v2057_v19 = vadd.f32 %v2056_v24, %v2055_v37 }
 0x17d   :  { %v496_v17 = vadd.f32 %v2095_v46, %v2057_v19 }
 0x18c   :  { %v2166_v38 = vpop.f32.mrb[4].mxu1 }
 0x18d   :  { %v2167_v32 = vpop.f32.mrb[5].mxu1 }
 0x18e   :  { %v2168_v7 = vadd.f32 %v2167_v32, %v2166_v38 }
 0x190   :  { %v2169_v22 = vpop.f32.mrb[6].mxu1 }
 0x191   :  { %v2170_v45 = vpop.f32.mrb[7].mxu1 }
 0x192   :  { %v2171_v1 = vadd.f32 %v2170_v45, %v2169_v22 }
 0x195   :  { %v2128_v59 = vpop.f32.mrb[4].mxu0 }
 0x196   :  { %v2129_v30 = vpop.f32.mrb[5].mxu0 }
 0x197   :  { %v2130_v9 = vadd.f32 %v2129_v30, %v2128_v59 }
 0x199   :  { %v634_v50 = vadd.f32 %v2130_v9, %v489_v2  ;;  %v2131_v28 = vpop.f32.mrb[6].mxu0 }
 0x19a   :  { %v2132_v62 = vpop.f32.mrb[7].mxu0 }
 0x19b   :  { %v2133_v40 = vadd.f32 %v2132_v62, %v2131_v28  ;;  %v751_v5 = vadd.f32 %v2168_v7, %v634_v50 }
 0x19d   :  { %v643_v43 = vadd.f32 %v2133_v40, %v496_v17 }
 0x19f   :  { %v762_v31 = vadd.f32 %v2171_v1, %v643_v43 }
 0x1ac   :  { %v2242_v3 = vpop.f32.mrb[8].mxu1 }
 0x1ad   :  { %v2243_v0 = vpop.f32.mrb[9].mxu1 }
 0x1ae   :  { %v2244_v6 = vadd.f32 %v2243_v0, %v2242_v3 }
 0x1b0   :  { %v2245_v34 = vpop.f32.mrb[10].mxu1 }
 0x1b1   :  { %v2246_v58 = vpop.f32.mrb[11].mxu1 }
 0x1b2   :  { %v2247_v41 = vadd.f32 %v2246_v58, %v2245_v34 }
 0x1b5   :  { %v2204_v63 = vpop.f32.mrb[8].mxu0 }
 0x1b6   :  { %v2205_v15 = vpop.f32.mrb[9].mxu0 }
 0x1b7   :  { %v2206_v11 = vadd.f32 %v2205_v15, %v2204_v63 }
 0x1b9   :  { %v930_v48 = vadd.f32 %v2206_v11, %v751_v5  ;;  %v2207_v10 = vpop.f32.mrb[10].mxu0 }
 0x1ba   :  { %v2208_v12 = vpop.f32.mrb[11].mxu0 }
 0x1bb   :  { %v2209_v60 = vadd.f32 %v2208_v12, %v2207_v10  ;;  %v1041_v14 = vadd.f32 %v2244_v6, %v930_v48 }
 0x1bd   :  { %v937_v29 = vadd.f32 %v2209_v60, %v762_v31 }
 0x1bf   :  { %v1048_v4 = vadd.f32 %v2247_v41, %v937_v29 }
 0x1cc   :  { %v2318_v55 = vpop.f32.mrb[12].mxu1 }
 0x1cd   :  { %v2319_v44 = vpop.f32.mrb[13].mxu1 }
 0x1ce   :  { %v2320_v53 = vadd.f32 %v2319_v44, %v2318_v55 }
 0x1d0   :  { %v2321_v52 = vpop.f32.mrb[14].mxu1 }
 0x1d1   :  { %v2322_v21 = vpop.f32.mrb[15].mxu1 }
 0x1d2   :  { %v2323_v56 = vadd.f32 %v2322_v21, %v2321_v52 }
 0x1d6   :  { %v2280_v39 = vpop.f32.mrb[12].mxu0 }
 0x1d7   :  { %v2281_v47 = vpop.f32.mrb[13].mxu0 }
 0x1d8   :  { %v2282_v35 = vadd.f32 %v2281_v47, %v2280_v39 }
 0x1da   :  { %v1160_v16 = vadd.f32 %v2282_v35, %v1041_v14  ;;  %v2283_v25 = vpop.f32.mrb[14].mxu0 }
 0x1db   :  { %v2284_v20 = vpop.f32.mrb[15].mxu0 }
 0x1dc   :  { %v2285_v26 = vadd.f32 %v2284_v20, %v2283_v25  ;;  %v1407_v61 = vadd.f32 %v2320_v53, %v1160_v16 }
 0x1de   :  { %v1175_v51 = vadd.f32 %v2285_v26, %v1048_v4 }
 0x1e0   :  { %v1414_v18 = vadd.f32 %v2323_v56, %v1175_v51 }
 0x1ec   :  { %v2394_v36 = vpop.f32.mrb[16].mxu1 }
 0x1ed   :  { %v2395_v8 = vpop.f32.mrb[17].mxu1 }
 0x1ee   :  { %v2396_v42 = vadd.f32 %v2395_v8, %v2394_v36 }
 0x1f0   :  { %v2397_v54 = vpop.f32.mrb[18].mxu1 }
 0x1f1   :  { %v2398_v13 = vpop.f32.mrb[19].mxu1 }
 0x1f2   :  { %v2399_v49 = vadd.f32 %v2398_v13, %v2397_v54 }
 0x1f6   :  { %v2356_v27 = vpop.f32.mrb[16].mxu0 }
 0x1f7   :  { %v2357_v46 = vpop.f32.mrb[17].mxu0 }
 0x1f8   :  { %v2358_v57 = vadd.f32 %v2357_v46, %v2356_v27 }
 0x1fa   :  { %v1552_v23 = vadd.f32 %v2358_v57, %v1407_v61  ;;  %v2359_v33 = vpop.f32.mrb[18].mxu0 }
 0x1fb   :  { %v2360_v2 = vpop.f32.mrb[19].mxu0 }
 0x1fc   :  { %v2361_v37 = vadd.f32 %v2360_v2, %v2359_v33  ;;  %v1669_v24 = vadd.f32 %v2396_v42, %v1552_v23 }
 0x1fe   :  { %v1561_v19 = vadd.f32 %v2361_v37, %v1414_v18 }
 0x200   :  { %v1680_v17 = vadd.f32 %v2399_v49, %v1561_v19 }
 0x20c   :  { %v2470_v38 = vpop.f32.mrb[20].mxu1 }
 0x20d   :  { %v2471_v32 = vpop.f32.mrb[21].mxu1 }
 0x20e   :  { %v2472_v7 = vadd.f32 %v2471_v32, %v2470_v38 }
 0x210   :  { %v2473_v22 = vpop.f32.mrb[22].mxu1 }
 0x211   :  { %v2474_v45 = vpop.f32.mrb[23].mxu1 }
 0x212   :  { %v2475_v1 = vadd.f32 %v2474_v45, %v2473_v22 }
 0x216   :  { %v2432_v59 = vpop.f32.mrb[20].mxu0 }
 0x217   :  { %v2433_v30 = vpop.f32.mrb[21].mxu0 }
 0x218   :  { %v2434_v9 = vadd.f32 %v2433_v30, %v2432_v59 }
 0x21a   :  { %v1848_v50 = vadd.f32 %v2434_v9, %v1669_v24  ;;  %v2435_v28 = vpop.f32.mrb[22].mxu0 }
 0x21b   :  { %v2436_v62 = vpop.f32.mrb[23].mxu0 }
 0x21c   :  { %v1959_v40 = vadd.f32 %v2472_v7, %v1848_v50  ;;  %v2437_v5 = vadd.f32 %v2436_v62, %v2435_v28 }
 0x21e   :  { %1969 = vst [vmem:[#allocation5] sm:$0xff] %v1959_v40  ;;  %v1855_v43 = vadd.f32 %v2437_v5, %v1680_v17 }
 0x220   :  { %v1966_v31 = vadd.f32 %v2475_v1, %v1855_v43 }
 0x222   :  { %1970 = vst [vmem:[#allocation5 + $0x8] sm:$0xff] %v1966_v31 }
 0x223   :  { %2901 = shalt.err (!%p2898_p12)
}
 0x224   :  { %s2902_s30 = scalar_lea.hbm %s4487_s2, 256 }
 0x225   :  { %p2903_p13 = scmp.ne.s32.totalorder %s4487_s2, %s2902_s30  ;;  %p2906_p0 = scmp.lt.u32.totalorder %s2902_s30, %s4487_s2 }
 0x227   :  { %p2908_p1 = pnand %p2906_p0, %p2903_p13 }
 0x229   :  { %2911 = shalt.err (!%p2908_p1)
}
 0x22a   :  { %1982 = dma.vmem_to_hbm [thread:$0]  %s1977_s1, 256, %s4487_s2, [#allocation4], %s2917_s19, %s2917_s19, %s2918_s20  }
 0x22b   :  { %2914 = dma.done.wait [#allocation4], 256  }
 0x22c   :  { %2915 = vsyncadd [#allocation4], 4294967040 }
 0x22d   :  { %1986 = vsyncpa [#allocation3], 1 }
 0x22e   :  { %1987 = vsyncpa [#allocation4], 1 }

</bundles_post_ra>
